<compile_context>
chip_gen: v5e
topology: v5e:2x2
jax: 0.10.0
libtpu: 0.0.40
codegen_flags: <defaults>
</compile_context>

<pallas_src>
import functools
import math

import jax
import jax.numpy as jnp
from jax import lax
from jax.experimental import pallas as pl
from jax.experimental.pallas import tpu as pltpu

# ---- small DBRX-like config --------------------------------------------------
D_MODEL = 64
N_HEADS = 4
KV_HEADS = 2                   # GQA
HEAD_DIM = D_MODEL // N_HEADS  # 16
NUM_EXPERTS = 4
TOP_K = 2
FFN_HIDDEN = 128
CLIP_QKV = 8.0
ROPE_THETA = 10000.0
LN_EPS = 1e-5                  # nn.LayerNorm default

# Tile targets: multiples of 256 to fill the v6e/v7x 256x256 MXU; at the demo
# shapes every dim is smaller than the target so tiles equal the full dims.
# TODO(synk): halve the K/F tile targets when running on v7x (64 MiB VMEM/TC).
TM = 256
TN = 256
TK = 512
VMEM_LIMIT = 32 * 1024 * 1024  # explicit scoped-VMEM budget (safe on all gens)


def _tile(dim, target):
    """Use `target` if it evenly divides `dim`, else fall back to the full dim."""
    return target if (dim >= target and dim % target == 0) else dim


# ----------------------------- Pallas kernels --------------------------------
def _ln_matmul_kernel(x_ref, g_ref, w_ref, o_ref, *, eps, clip):
    """Fused LayerNorm(no bias) -> xn @ W [-> clip_qkv]."""
    x = x_ref[...].astype(jnp.float32)
    mean = jnp.mean(x, axis=-1, keepdims=True)
    var = jnp.mean(jnp.square(x - mean), axis=-1, keepdims=True)
    xn = (x - mean) * lax.rsqrt(var + eps) * g_ref[...].astype(jnp.float32)
    y = jnp.dot(xn, w_ref[...].astype(jnp.float32),
                preferred_element_type=jnp.float32)
    if clip is not None:
        y = jnp.clip(y, -clip, clip)
    o_ref[...] = y.astype(o_ref.dtype)


def ln_matmul(x, gamma, w, clip=None):
    """LayerNorm fused into a tiled (M, N) matmul.  K (= d_model) stays untiled
    so the LN statistics remain exact; both grid axes are megacore-parallel."""
    T, D = x.shape
    _, N = w.shape
    tm, tn = _tile(T, TM), _tile(N, TN)
    return pl.pallas_call(
        functools.partial(_ln_matmul_kernel, eps=LN_EPS, clip=clip),
        out_shape=jax.ShapeDtypeStruct((T, N), x.dtype),
        grid=(T // tm, N // tn),
        in_specs=[pl.BlockSpec((tm, D), lambda i, j: (i, 0)),
                  pl.BlockSpec((1, D), lambda i, j: (0, 0)),
                  pl.BlockSpec((D, tn), lambda i, j: (0, j))],
        out_specs=pl.BlockSpec((tm, tn), lambda i, j: (i, j)),
        compiler_params=pltpu.CompilerParams(
            dimension_semantics=("parallel", "parallel"),
            vmem_limit_bytes=VMEM_LIMIT),
    )(x, gamma.reshape(1, D), w)


def _matmul_residual_kernel(a_ref, b_ref, r_ref, o_ref, acc_ref):
    """Tiled matmul with f32 VMEM accumulator; residual added on last K step."""
    @pl.when(pl.program_id(2) == 0)
    def _():
        acc_ref[...] = jnp.zeros_like(acc_ref)

    acc_ref[...] += jnp.dot(a_ref[...], b_ref[...],
                            preferred_element_type=jnp.float32)

    @pl.when(pl.program_id(2) == pl.num_programs(2) - 1)
    def _():
        o_ref[...] = (acc_ref[...] +
                      r_ref[...].astype(jnp.float32)).astype(o_ref.dtype)


def matmul_residual(a, b, residual):
    M, K = a.shape
    _, N = b.shape
    tm, tn, tk = _tile(M, TM), _tile(N, TN), _tile(K, TK)
    return pl.pallas_call(
        _matmul_residual_kernel,
        out_shape=jax.ShapeDtypeStruct((M, N), residual.dtype),
        grid=(M // tm, N // tn, K // tk),
        in_specs=[pl.BlockSpec((tm, tk), lambda i, j, k: (i, k)),
                  pl.BlockSpec((tk, tn), lambda i, j, k: (k, j)),
                  pl.BlockSpec((tm, tn), lambda i, j, k: (i, j))],
        out_specs=pl.BlockSpec((tm, tn), lambda i, j, k: (i, j)),
        scratch_shapes=[pltpu.VMEM((tm, tn), jnp.float32)],
        compiler_params=pltpu.CompilerParams(
            dimension_semantics=("parallel", "parallel", "arbitrary"),
            vmem_limit_bytes=VMEM_LIMIT),
    )(a, b, residual)


def _ln_router_kernel(x_ref, g_ref, w_ref, h_ref, p_ref, *, eps):
    """Fused LayerNorm -> router GEMM -> softmax.  Also emits the normalized
    activations (h) so the expert kernel never re-reads/re-normalizes x."""
    x = x_ref[...].astype(jnp.float32)
    mean = jnp.mean(x, axis=-1, keepdims=True)
    var = jnp.mean(jnp.square(x - mean), axis=-1, keepdims=True)
    xn = (x - mean) * lax.rsqrt(var + eps) * g_ref[...].astype(jnp.float32)
    h_ref[...] = xn.astype(h_ref.dtype)
    logits = jnp.dot(xn, w_ref[...].astype(jnp.float32),
                     preferred_element_type=jnp.float32)
    m = jnp.max(logits, axis=-1, keepdims=True)
    e = jnp.exp(logits - m)
    p_ref[...] = (e / jnp.sum(e, axis=-1, keepdims=True)).astype(p_ref.dtype)


def ln_router(x, gamma, w_router):
    T, D = x.shape
    _, E = w_router.shape
    tm = _tile(T, TM)
    return pl.pallas_call(
        functools.partial(_ln_router_kernel, eps=LN_EPS),
        out_shape=(jax.ShapeDtypeStruct((T, D), x.dtype),
                   jax.ShapeDtypeStruct((T, E), jnp.float32)),
        grid=(T // tm,),
        in_specs=[pl.BlockSpec((tm, D), lambda i: (i, 0)),
                  pl.BlockSpec((1, D), lambda i: (0, 0)),
                  pl.BlockSpec((D, E), lambda i: (0, 0))],
        out_specs=(pl.BlockSpec((tm, D), lambda i: (i, 0)),
                   pl.BlockSpec((tm, E), lambda i: (i, 0))),
        compiler_params=pltpu.CompilerParams(
            dimension_semantics=("parallel",),
            vmem_limit_bytes=VMEM_LIMIT),
    )(x, gamma.reshape(1, D), w_router)


def _attention_kernel(q_ref, k_ref, v_ref, cos_ref, sin_ref, o_ref, k_out_ref,
                      *, n_heads, kv_heads, head_dim, scale):
    """Causal GQA attention for one batch element, all heads per grid step,
    with RoPE fused in-kernel.  rotate_half is a signed-permutation matmul
    (MXU), avoiding lane-axis concatenation/rolls on sub-128 head_dim."""
    S = q_ref.shape[2]
    group = n_heads // kv_heads
    half = head_dim // 2

    cos = cos_ref[0].astype(jnp.float32)          # (S, hd)
    sin = sin_ref[0].astype(jnp.float32)

    r_i = lax.broadcasted_iota(jnp.int32, (head_dim, head_dim), 0)
    c_i = lax.broadcasted_iota(jnp.int32, (head_dim, head_dim), 1)
    rot = (jnp.where(r_i == c_i + half, -1.0, 0.0) +
           jnp.where(c_i == r_i + half, 1.0, 0.0)).astype(jnp.float32)

    def rope(x):                                  # x: (S, hd) f32
        return x * cos + jnp.dot(x, rot, preferred_element_type=jnp.float32) * sin

    row = lax.broadcasted_iota(jnp.int32, (S, S), 0)
    col = lax.broadcasted_iota(jnp.int32, (S, S), 1)
    causal = row >= col
    # TODO(synk): no attention_mask / past_key_value plumbing; causal-only.
    # TODO(synk): for long sequences convert to a flash-style KV-tiled kernel.

    k_rot, v_heads = [], []
    for kv in range(kv_heads):                    # small static unroll
        k_h = rope(k_ref[0, kv].astype(jnp.float32))
        k_rot.append(k_h)
        v_heads.append(v_ref[0, kv].astype(jnp.float32))
        k_out_ref[0, kv] = k_h.astype(k_out_ref.dtype)   # post-RoPE K cache

    for h in range(n_heads):                      # all heads in one grid step
        q_h = rope(q_ref[0, h].astype(jnp.float32))
        kv = h // group                           # GQA sharing of K/V heads
        s = lax.dot_general(q_h, k_rot[kv], (((1,), (1,)), ((), ())),
                            preferred_element_type=jnp.float32) * scale
        s = jnp.where(causal, s, -1e30)
        m = jnp.max(s, axis=-1, keepdims=True)
        p = jnp.exp(s - m)
        p = p / jnp.sum(p, axis=-1, keepdims=True)
        o_ref[0, h] = jnp.dot(p, v_heads[kv],
                              preferred_element_type=jnp.float32).astype(o_ref.dtype)


def attention(q, k, v, cos, sin):
    B, H, S, hd = q.shape
    KVH = k.shape[1]
    scale = 1.0 / math.sqrt(hd)
    kern = functools.partial(_attention_kernel, n_heads=H, kv_heads=KVH,
                             head_dim=hd, scale=scale)
    return pl.pallas_call(
        kern,
        out_shape=(jax.ShapeDtypeStruct((B, H, S, hd), jnp.float32),
                   jax.ShapeDtypeStruct((B, KVH, S, hd), jnp.float32)),
        grid=(B,),
        in_specs=[pl.BlockSpec((1, H, S, hd), lambda b: (b, 0, 0, 0)),
                  pl.BlockSpec((1, KVH, S, hd), lambda b: (b, 0, 0, 0)),
                  pl.BlockSpec((1, KVH, S, hd), lambda b: (b, 0, 0, 0)),
                  pl.BlockSpec((1, S, hd), lambda b: (b, 0, 0)),
                  pl.BlockSpec((1, S, hd), lambda b: (b, 0, 0))],
        out_specs=(pl.BlockSpec((1, H, S, hd), lambda b: (b, 0, 0, 0)),
                   pl.BlockSpec((1, KVH, S, hd), lambda b: (b, 0, 0, 0))),
        compiler_params=pltpu.CompilerParams(
            dimension_semantics=("parallel",),
            vmem_limit_bytes=VMEM_LIMIT),
    )(q, k, v, cos, sin)


def _moe_kernel(h_ref, r_ref, wg_ref, wu_ref, wd_ref, rw_ref, o_ref, acc_ref):
    """Per-expert SiLU-GLU MLP accumulated into an f32 VMEM scratch; residual
    added and stored once on the final expert step (no per-step RMW of o_ref,
    no iota/where routing-weight select)."""
    e = pl.program_id(1)

    @pl.when(e == 0)
    def _():
        acc_ref[...] = jnp.zeros_like(acc_ref)

    x = h_ref[...].astype(jnp.float32)
    g = jnp.dot(x, wg_ref[0], preferred_element_type=jnp.float32)
    u = jnp.dot(x, wu_ref[0], preferred_element_type=jnp.float32)
    act = (g * jax.nn.sigmoid(g)) * u            # SiLU-GLU (DBRX ffn_act_fn)
    y = jnp.dot(act, wd_ref[0], preferred_element_type=jnp.float32)
    acc_ref[...] += y * rw_ref[0]                # (tm, 1) routing-weight column

    @pl.when(e == pl.num_programs(1) - 1)
    def _():
        o_ref[...] = (acc_ref[...] +
                      r_ref[...].astype(jnp.float32)).astype(o_ref.dtype)


def moe_experts(h, residual, wg, wu, wd, route_col):
    # TODO(synk): dense all-expert compute; grouped top-k dispatch via
    # PrefetchScalarGridSpec (sorted token groups) is the next step for real
    # DBRX expert counts, along with F/D tiling of the expert weights.
    T, D = h.shape
    E, _, F = wg.shape
    tm = _tile(T, TM)
    return pl.pallas_call(
        _moe_kernel,
        out_shape=jax.ShapeDtypeStruct((T, D), residual.dtype),
        grid=(T // tm, E),
        in_specs=[pl.BlockSpec((tm, D), lambda i, e: (i, 0)),
                  pl.BlockSpec((tm, D), lambda i, e: (i, 0)),
                  pl.BlockSpec((1, D, F), lambda i, e: (e, 0, 0)),
                  pl.BlockSpec((1, D, F), lambda i, e: (e, 0, 0)),
                  pl.BlockSpec((1, F, D), lambda i, e: (e, 0, 0)),
                  pl.BlockSpec((1, tm, 1), lambda i, e: (e, i, 0))],
        out_specs=pl.BlockSpec((tm, D), lambda i, e: (i, 0)),
        scratch_shapes=[pltpu.VMEM((tm, D), jnp.float32)],
        compiler_params=pltpu.CompilerParams(
            dimension_semantics=("parallel", "arbitrary"),
            vmem_limit_bytes=VMEM_LIMIT),
    )(h, residual, wg, wu, wd, route_col)


# ------------------------------ JAX glue --------------------------------------
def rope_cos_sin(position_ids, head_dim, base):
    inv_freq = 1.0 / (base ** (jnp.arange(0, head_dim, 2, dtype=jnp.float32) / head_dim))
    angles = position_ids.astype(jnp.float32)[..., None] * inv_freq[None, None, :]
    emb = jnp.concatenate([angles, angles], axis=-1)       # (B, S, hd)
    return jnp.cos(emb), jnp.sin(emb)


def init_params(key):
    keys = jax.random.split(key, 8)

    def w(k, shape, scale=0.02):
        return scale * jax.random.normal(k, shape, dtype=jnp.float32)

    qkv_out = (N_HEADS + 2 * KV_HEADS) * HEAD_DIM
    return dict(
        ln1_w=1.0 + 0.01 * jax.random.normal(keys[0], (D_MODEL,), dtype=jnp.float32),
        ln2_w=1.0 + 0.01 * jax.random.normal(keys[1], (D_MODEL,), dtype=jnp.float32),
        wqkv=w(keys[2], (D_MODEL, qkv_out)),
        wo=w(keys[3], (D_MODEL, D_MODEL)),
        w_router=w(keys[4], (D_MODEL, NUM_EXPERTS)),
        wg=w(keys[5], (NUM_EXPERTS, D_MODEL, FFN_HIDDEN)),
        wu=w(keys[6], (NUM_EXPERTS, D_MODEL, FFN_HIDDEN)),
        wd=w(keys[7], (NUM_EXPERTS, FFN_HIDDEN, D_MODEL)),
    )


def dbrx_block_forward(hidden_states, position_ids, params):
    B, S, D = hidden_states.shape
    T = B * S
    x = hidden_states.reshape(T, D)

    # ---- attention sub-block: LN1 fused into QKV GEMM (clip_qkv); RoPE fused
    # ---- into the attention kernel; residual fused into the out-proj GEMM.
    residual = x
    qkv = ln_matmul(x, params["ln1_w"], params["wqkv"], clip=CLIP_QKV)
    q_sz = N_HEADS * HEAD_DIM
    kv_sz = KV_HEADS * HEAD_DIM
    q = qkv[:, :q_sz].reshape(B, S, N_HEADS, HEAD_DIM).transpose(0, 2, 1, 3)
    k = qkv[:, q_sz:q_sz + kv_sz].reshape(B, S, KV_HEADS, HEAD_DIM).transpose(0, 2, 1, 3)
    v = qkv[:, q_sz + kv_sz:].reshape(B, S, KV_HEADS, HEAD_DIM).transpose(0, 2, 1, 3)
    cos, sin = rope_cos_sin(position_ids, HEAD_DIM, ROPE_THETA)
    attn, k_rot = attention(q, k, v, cos, sin)             # (B,H,S,hd), (B,KVH,S,hd)
    attn2d = attn.transpose(0, 2, 1, 3).reshape(T, D)
    x = matmul_residual(attn2d, params["wo"], residual)

    # ---- MoE sub-block: LN2 + router GEMM + softmax fused; experts accumulate
    # ---- in VMEM scratch, weighted by a lane-free per-expert column, residual
    # ---- added on the last expert step.
    residual = x
    h, probs = ln_router(x, params["ln2_w"], params["w_router"])
    topk_vals, topk_idx = lax.top_k(probs, TOP_K)
    topk_vals = topk_vals / jnp.sum(topk_vals, axis=-1, keepdims=True)  # normalize_top_k_affinities
    route = jnp.zeros((T, NUM_EXPERTS), jnp.float32).at[
        jnp.arange(T)[:, None], topk_idx].set(topk_vals)
    route_col = route.T.reshape(NUM_EXPERTS, T, 1)          # (E, T, 1) per-expert weight column
    x = moe_experts(h, residual, params["wg"], params["wu"], params["wd"], route_col)

    out = x.reshape(B, S, D)
    present_key_value = (k_rot, v)                          # post-RoPE K, V cache
    return out, present_key_value


if __name__ == "__main__":
    B, S = 2, 8
    key = jax.random.PRNGKey(0)
    kx, kp = jax.random.split(key)
    hidden_states = jax.random.normal(kx, (B, S, D_MODEL), dtype=jnp.float32)
    position_ids = jnp.broadcast_to(jnp.arange(S, dtype=jnp.int32)[None, :], (B, S))
    params = init_params(kp)

    out, (k_cache, v_cache) = jax.jit(dbrx_block_forward)(hidden_states, position_ids, params)
    jax.block_until_ready(out)

    assert out.shape == (B, S, D_MODEL)
    assert k_cache.shape == (B, KV_HEADS, S, HEAD_DIM)
    assert v_cache.shape == (B, KV_HEADS, S, HEAD_DIM)
    assert bool(jnp.all(jnp.isfinite(out)))
    print("KERNEL_OK")
</pallas_src>

<mosaic_0001>
module attributes {stable_mosaic.version = 11 : i64} {
  func.func @_ln_matmul_kernel(%arg0: i32, %arg1: i32, %arg2: memref<16x64xf32, #tpu.memory_space<vmem>>, %arg3: memref<1x64xf32, #tpu.memory_space<vmem>>, %arg4: memref<64x128xf32, #tpu.memory_space<vmem>>, %arg5: memref<16x128xf32, #tpu.memory_space<vmem>>) attributes {dimension_semantics = [#tpu.dimension_semantics<parallel>, #tpu.dimension_semantics<parallel>], iteration_bounds = array<i64: 1, 1>, scalar_prefetch = 0 : i64, scratch_operands = 0 : i64, tpu.core_type = #tpu.core_type<tc>, window_params = [{transform_indices = @transform_0, window_bounds = array<i64: 16, 64>}, {pipeline_mode = #tpu.pipeline_mode<synchronous>, transform_indices = @transform_1, window_bounds = array<i64: 1, 64>}, {transform_indices = @transform_2, window_bounds = array<i64: 64, 128>}, {transform_indices = @transform_3, window_bounds = array<i64: 16, 128>}]} {
    %c0 = arith.constant 0 : index
    %c0_0 = arith.constant 0 : index
    %0 = vector.load %arg2[%c0, %c0_0] : memref<16x64xf32, #tpu.memory_space<vmem>>, vector<16x64xf32>
    %cst = arith.constant dense<0.000000e+00> : vector<16xf32>
    %1 = vector.multi_reduction <add>, %0, %cst [1] : vector<16x64xf32> to vector<16xf32>
    %2 = vector.shape_cast %1 : vector<16xf32> to vector<16x1xf32>
    %cst_1 = arith.constant 6.400000e+01 : f32
    %3 = vector.broadcast %cst_1 : f32 to vector<16x1xf32>
    %4 = arith.divf %2, %3 : vector<16x1xf32>
    %5 = vector.broadcast %4 : vector<16x1xf32> to vector<16x64xf32>
    %6 = arith.subf %0, %5 : vector<16x64xf32>
    %7 = arith.mulf %6, %6 : vector<16x64xf32>
    %cst_2 = arith.constant dense<0.000000e+00> : vector<16xf32>
    %8 = vector.multi_reduction <add>, %7, %cst_2 [1] : vector<16x64xf32> to vector<16xf32>
    %9 = vector.shape_cast %8 : vector<16xf32> to vector<16x1xf32>
    %cst_3 = arith.constant 6.400000e+01 : f32
    %10 = vector.broadcast %cst_3 : f32 to vector<16x1xf32>
    %11 = arith.divf %9, %10 : vector<16x1xf32>
    %12 = vector.broadcast %4 : vector<16x1xf32> to vector<16x64xf32>
    %13 = arith.subf %0, %12 : vector<16x64xf32>
    %cst_4 = arith.constant 9.99999974E-6 : f32
    %14 = vector.broadcast %cst_4 : f32 to vector<16x1xf32>
    %15 = arith.addf %11, %14 : vector<16x1xf32>
    %16 = math.rsqrt %15 : vector<16x1xf32>
    %17 = vector.broadcast %16 : vector<16x1xf32> to vector<16x64xf32>
    %18 = arith.mulf %13, %17 : vector<16x64xf32>
    %c0_5 = arith.constant 0 : index
    %c0_6 = arith.constant 0 : index
    %19 = vector.load %arg3[%c0_5, %c0_6] : memref<1x64xf32, #tpu.memory_space<vmem>>, vector<1x64xf32>
    %20 = vector.broadcast %19 : vector<1x64xf32> to vector<16x64xf32>
    %21 = arith.mulf %18, %20 : vector<16x64xf32>
    %c0_7 = arith.constant 0 : index
    %c0_8 = arith.constant 0 : index
    %22 = vector.load %arg4[%c0_7, %c0_8] : memref<64x128xf32, #tpu.memory_space<vmem>>, vector<64x128xf32>
    %cst_9 = arith.constant dense<0.000000e+00> : vector<16x128xf32>
    %23 = tpu.matmul %21, %22, %cst_9 {dimension_numbers = #tpu.dot_dimension_numbers<[1], [0], [0], [1], [0, 0, 1, 1], [], []>} : vector<16x64xf32>, vector<64x128xf32>, vector<16x128xf32> -> vector<16x128xf32>
    %cst_10 = arith.constant -8.000000e+00 : f32
    %cst_11 = arith.constant 8.000000e+00 : f32
    %24 = vector.broadcast %cst_10 : f32 to vector<16x128xf32>
    %25 = arith.maximumf %24, %23 : vector<16x128xf32>
    %26 = vector.broadcast %cst_11 : f32 to vector<16x128xf32>
    %27 = arith.minimumf %26, %25 : vector<16x128xf32>
    %c0_12 = arith.constant 0 : index
    %c0_13 = arith.constant 0 : index
    %28 = vector.load %arg5[%c0_12, %c0_13] : memref<16x128xf32, #tpu.memory_space<vmem>>, vector<16x128xf32>
    tpu.vector_store %arg5[%c0_12, %c0_13], %27 {strides = array<i32>} : memref<16x128xf32, #tpu.memory_space<vmem>>, vector<16x128xf32>,
    return
  }
  func.func @transform_0(%arg0: i32, %arg1: i32) -> (i32, i32) {
    %c0_i32 = arith.constant 0 : i32
    %c0_i32_0 = arith.constant 0 : i32
    return %arg0, %c0_i32 : i32, i32
  }
  func.func @transform_1(%arg0: i32, %arg1: i32) -> (i32, i32) {
    %c0_i32 = arith.constant 0 : i32
    %c0_i32_0 = arith.constant 0 : i32
    %c0_i32_1 = arith.constant 0 : i32
    return %c0_i32, %c0_i32_0 : i32, i32
  }
  func.func @transform_2(%arg0: i32, %arg1: i32) -> (i32, i32) {
    %c0_i32 = arith.constant 0 : i32
    %c0_i32_0 = arith.constant 0 : i32
    return %c0_i32, %arg1 : i32, i32
  }
  func.func @transform_3(%arg0: i32, %arg1: i32) -> (i32, i32) {
    %c0_i32 = arith.constant 0 : i32
    return %arg0, %arg1 : i32, i32
  }
}

module attributes {stable_mosaic.version = 11 : i64} {
  func.func @_attention_kernel(%arg0: i32, %arg1: memref<1x4x8x16xf32, #tpu.memory_space<vmem>>, %arg2: memref<1x2x8x16xf32, #tpu.memory_space<vmem>>, %arg3: memref<1x2x8x16xf32, #tpu.memory_space<vmem>>, %arg4: memref<1x8x16xf32, #tpu.memory_space<vmem>>, %arg5: memref<1x8x16xf32, #tpu.memory_space<vmem>>, %arg6: memref<1x4x8x16xf32, #tpu.memory_space<vmem>>, %arg7: memref<1x2x8x16xf32, #tpu.memory_space<vmem>>) attributes {dimension_semantics = [#tpu.dimension_semantics<parallel>], iteration_bounds = array<i64: 2>, scalar_prefetch = 0 : i64, scratch_operands = 0 : i64, tpu.core_type = #tpu.core_type<tc>, window_params = [{transform_indices = @transform_0, window_bounds = array<i64: 1, 4, 8, 16>}, {transform_indices = @transform_1, window_bounds = array<i64: 1, 2, 8, 16>}, {transform_indices = @transform_2, window_bounds = array<i64: 1, 2, 8, 16>}, {transform_indices = @transform_3, window_bounds = array<i64: 1, 8, 16>}, {transform_indices = @transform_4, window_bounds = array<i64: 1, 8, 16>}, {transform_indices = @transform_5, window_bounds = array<i64: 1, 4, 8, 16>}, {transform_indices = @transform_6, window_bounds = array<i64: 1, 2, 8, 16>}]} {
    %c0 = arith.constant 0 : index
    %c0_0 = arith.constant 0 : index
    %c0_1 = arith.constant 0 : index
    %0 = vector.load %arg4[%c0, %c0_0, %c0_1] : memref<1x8x16xf32, #tpu.memory_space<vmem>>, vector<1x8x16xf32>
    %1 = vector.shape_cast %0 : vector<1x8x16xf32> to vector<8x16xf32>
    %c0_2 = arith.constant 0 : index
    %c0_3 = arith.constant 0 : index
    %c0_4 = arith.constant 0 : index
    %2 = vector.load %arg5[%c0_2, %c0_3, %c0_4] : memref<1x8x16xf32, #tpu.memory_space<vmem>>, vector<1x8x16xf32>
    %3 = vector.shape_cast %2 : vector<1x8x16xf32> to vector<8x16xf32>
    %4 = tpu.iota {dimensions = array<i32: 0>} : vector<16x16xi32>
    %5 = tpu.iota {dimensions = array<i32: 1>} : vector<16x16xi32>
    %c8_i32 = arith.constant 8 : i32
    %6 = vector.broadcast %c8_i32 : i32 to vector<16x16xi32>
    %7 = arith.addi %5, %6 : vector<16x16xi32>
    %8 = arith.cmpi eq, %4, %7 : vector<16x16xi32>
    %cst = arith.constant -1.000000e+00 : f32
    %cst_5 = arith.constant 0.000000e+00 : f32
    %9 = vector.broadcast %cst : f32 to vector<16x16xf32>
    %10 = vector.broadcast %cst_5 : f32 to vector<16x16xf32>
    %11 = arith.select %8, %9, %10 : vector<16x16xi1>, vector<16x16xf32>
    %c8_i32_6 = arith.constant 8 : i32
    %12 = vector.broadcast %c8_i32_6 : i32 to vector<16x16xi32>
    %13 = arith.addi %4, %12 : vector<16x16xi32>
    %14 = arith.cmpi eq, %5, %13 : vector<16x16xi32>
    %cst_7 = arith.constant 1.000000e+00 : f32
    %cst_8 = arith.constant 0.000000e+00 : f32
    %15 = vector.broadcast %cst_7 : f32 to vector<16x16xf32>
    %16 = vector.broadcast %cst_8 : f32 to vector<16x16xf32>
    %17 = arith.select %14, %15, %16 : vector<16x16xi1>, vector<16x16xf32>
    %18 = arith.addf %11, %17 : vector<16x16xf32>
    %19 = tpu.iota {dimensions = array<i32: 0>} : vector<8x8xi32>
    %20 = tpu.iota {dimensions = array<i32: 1>} : vector<8x8xi32>
    %21 = arith.cmpi sge, %19, %20 : vector<8x8xi32>
    %c0_9 = arith.constant 0 : index
    %c0_10 = arith.constant 0 : index
    %c0_11 = arith.constant 0 : index
    %c0_12 = arith.constant 0 : index
    %22 = vector.load %arg2[%c0_9, %c0_10, %c0_11, %c0_12] : memref<1x2x8x16xf32, #tpu.memory_space<vmem>>, vector<1x1x8x16xf32>
    %23 = vector.shape_cast %22 : vector<1x1x8x16xf32> to vector<8x16xf32>
    %24 = arith.mulf %23, %1 : vector<8x16xf32>
    %cst_13 = arith.constant dense<0.000000e+00> : vector<8x16xf32>
    %25 = tpu.matmul %23, %18, %cst_13 {dimension_numbers = #tpu.dot_dimension_numbers<[1], [0], [0], [1], [0, 0, 1, 1], [], []>} : vector<8x16xf32>, vector<16x16xf32>, vector<8x16xf32> -> vector<8x16xf32>
    %26 = arith.mulf %25, %3 : vector<8x16xf32>
    %27 = arith.addf %24, %26 : vector<8x16xf32>
    %c0_14 = arith.constant 0 : index
    %c0_15 = arith.constant 0 : index
    %c0_16 = arith.constant 0 : index
    %c0_17 = arith.constant 0 : index
    %28 = vector.load %arg3[%c0_14, %c0_15, %c0_16, %c0_17] : memref<1x2x8x16xf32, #tpu.memory_space<vmem>>, vector<1x1x8x16xf32>
    %29 = vector.shape_cast %28 : vector<1x1x8x16xf32> to vector<8x16xf32>
    %c0_18 = arith.constant 0 : index
    %c0_19 = arith.constant 0 : index
    %c0_20 = arith.constant 0 : index
    %c0_21 = arith.constant 0 : index
    %30 = vector.load %arg7[%c0_18, %c0_19, %c0_20, %c0_21] : memref<1x2x8x16xf32, #tpu.memory_space<vmem>>, vector<1x1x8x16xf32>
    %31 = vector.shape_cast %30 : vector<1x1x8x16xf32> to vector<8x16xf32>
    %32 = vector.shape_cast %27 : vector<8x16xf32> to vector<1x1x8x16xf32>
    tpu.vector_store %arg7[%c0_18, %c0_19, %c0_20, %c0_21], %32 {strides = array<i32>} : memref<1x2x8x16xf32, #tpu.memory_space<vmem>>, vector<1x1x8x16xf32>,
    %c0_22 = arith.constant 0 : index
    %c1 = arith.constant 1 : index
    %c0_23 = arith.constant 0 : index
    %c0_24 = arith.constant 0 : index
    %33 = vector.load %arg2[%c0_22, %c1, %c0_23, %c0_24] : memref<1x2x8x16xf32, #tpu.memory_space<vmem>>, vector<1x1x8x16xf32>
    %34 = vector.shape_cast %33 : vector<1x1x8x16xf32> to vector<8x16xf32>
    %35 = arith.mulf %34, %1 : vector<8x16xf32>
    %cst_25 = arith.constant dense<0.000000e+00> : vector<8x16xf32>
    %36 = tpu.matmul %34, %18, %cst_25 {dimension_numbers = #tpu.dot_dimension_numbers<[1], [0], [0], [1], [0, 0, 1, 1], [], []>} : vector<8x16xf32>, vector<16x16xf32>, vector<8x16xf32> -> vector<8x16xf32>
    %37 = arith.mulf %36, %3 : vector<8x16xf32>
    %38 = arith.addf %35, %37 : vector<8x16xf32>
    %c0_26 = arith.constant 0 : index
    %c1_27 = arith.constant 1 : index
    %c0_28 = arith.constant 0 : index
    %c0_29 = arith.constant 0 : index
    %39 = vector.load %arg3[%c0_26, %c1_27, %c0_28, %c0_29] : memref<1x2x8x16xf32, #tpu.memory_space<vmem>>, vector<1x1x8x16xf32>
    %40 = vector.shape_cast %39 : vector<1x1x8x16xf32> to vector<8x16xf32>
    %c0_30 = arith.constant 0 : index
    %c1_31 = arith.constant 1 : index
    %c0_32 = arith.constant 0 : index
    %c0_33 = arith.constant 0 : index
    %41 = vector.load %arg7[%c0_30, %c1_31, %c0_32, %c0_33] : memref<1x2x8x16xf32, #tpu.memory_space<vmem>>, vector<1x1x8x16xf32>
    %42 = vector.shape_cast %41 : vector<1x1x8x16xf32> to vector<8x16xf32>
    %43 = vector.shape_cast %38 : vector<8x16xf32> to vector<1x1x8x16xf32>
    tpu.vector_store %arg7[%c0_30, %c1_31, %c0_32, %c0_33], %43 {strides = array<i32>} : memref<1x2x8x16xf32, #tpu.memory_space<vmem>>, vector<1x1x8x16xf32>,
    %c0_34 = arith.constant 0 : index
    %c0_35 = arith.constant 0 : index
    %c0_36 = arith.constant 0 : index
    %c0_37 = arith.constant 0 : index
    %44 = vector.load %arg1[%c0_34, %c0_35, %c0_36, %c0_37] : memref<1x4x8x16xf32, #tpu.memory_space<vmem>>, vector<1x1x8x16xf32>
    %45 = vector.shape_cast %44 : vector<1x1x8x16xf32> to vector<8x16xf32>
    %46 = arith.mulf %45, %1 : vector<8x16xf32>
    %cst_38 = arith.constant dense<0.000000e+00> : vector<8x16xf32>
    %47 = tpu.matmul %45, %18, %cst_38 {dimension_numbers = #tpu.dot_dimension_numbers<[1], [0], [0], [1], [0, 0, 1, 1], [], []>} : vector<8x16xf32>, vector<16x16xf32>, vector<8x16xf32> -> vector<8x16xf32>
    %48 = arith.mulf %47, %3 : vector<8x16xf32>
    %49 = arith.addf %46, %48 : vector<8x16xf32>
    %cst_39 = arith.constant dense<0.000000e+00> : vector<8x8xf32>
    %50 = tpu.matmul %49, %27, %cst_39 {dimension_numbers = #tpu.dot_dimension_numbers<[1], [1], [0], [0], [0, 0, 1, 0], [], []>} : vector<8x16xf32>, vector<8x16xf32>, vector<8x8xf32> -> vector<8x8xf32>
    %cst_40 = arith.constant 2.500000e-01 : f32
    %51 = vector.broadcast %cst_40 : f32 to vector<8x8xf32>
    %52 = arith.mulf %50, %51 : vector<8x8xf32>
    %cst_41 = arith.constant -1.000000e+30 : f32
    %53 = vector.broadcast %cst_41 : f32 to vector<8x8xf32>
    %54 = arith.select %21, %52, %53 : vector<8x8xi1>, vector<8x8xf32>
    %cst_42 = arith.constant dense<0xFF800000> : vector<8xf32>
    %55 = vector.multi_reduction <maximumf>, %54, %cst_42 [1] : vector<8x8xf32> to vector<8xf32>
    %56 = vector.shape_cast %55 : vector<8xf32> to vector<8x1xf32>
    %57 = vector.broadcast %56 : vector<8x1xf32> to vector<8x8xf32>
    %58 = arith.subf %54, %57 : vector<8x8xf32>
    %59 = math.exp %58 : vector<8x8xf32>
    %cst_43 = arith.constant dense<0.000000e+00> : vector<8xf32>
    %60 = vector.multi_reduction <add>, %59, %cst_43 [1] : vector<8x8xf32> to vector<8xf32>
    %61 = vector.shape_cast %60 : vector<8xf32> to vector<8x1xf32>
    %62 = vector.broadcast %61 : vector<8x1xf32> to vector<8x8xf32>
    %63 = arith.divf %59, %62 : vector<8x8xf32>
    %cst_44 = arith.constant dense<0.000000e+00> : vector<8x16xf32>
    %64 = tpu.matmul %63, %29, %cst_44 {dimension_numbers = #tpu.dot_dimension_numbers<[1], [0], [0], [1], [0, 0, 1, 1], [], []>} : vector<8x8xf32>, vector<8x16xf32>, vector<8x16xf32> -> vector<8x16xf32>
    %c0_45 = arith.constant 0 : index
    %c0_46 = arith.constant 0 : index
    %c0_47 = arith.constant 0 : index
    %c0_48 = arith.constant 0 : index
    %65 = vector.load %arg6[%c0_45, %c0_46, %c0_47, %c0_48] : memref<1x4x8x16xf32, #tpu.memory_space<vmem>>, vector<1x1x8x16xf32>
    %66 = vector.shape_cast %65 : vector<1x1x8x16xf32> to vector<8x16xf32>
    %67 = vector.shape_cast %64 : vector<8x16xf32> to vector<1x1x8x16xf32>
    tpu.vector_store %arg6[%c0_45, %c0_46, %c0_47, %c0_48], %67 {strides = array<i32>} : memref<1x4x8x16xf32, #tpu.memory_space<vmem>>, vector<1x1x8x16xf32>,
    %c0_49 = arith.constant 0 : index
    %c1_50 = arith.constant 1 : index
    %c0_51 = arith.constant 0 : index
    %c0_52 = arith.constant 0 : index
    %68 = vector.load %arg1[%c0_49, %c1_50, %c0_51, %c0_52] : memref<1x4x8x16xf32, #tpu.memory_space<vmem>>, vector<1x1x8x16xf32>
    %69 = vector.shape_cast %68 : vector<1x1x8x16xf32> to vector<8x16xf32>
    %70 = arith.mulf %69, %1 : vector<8x16xf32>
    %cst_53 = arith.constant dense<0.000000e+00> : vector<8x16xf32>
    %71 = tpu.matmul %69, %18, %cst_53 {dimension_numbers = #tpu.dot_dimension_numbers<[1], [0], [0], [1], [0, 0, 1, 1], [], []>} : vector<8x16xf32>, vector<16x16xf32>, vector<8x16xf32> -> vector<8x16xf32>
    %72 = arith.mulf %71, %3 : vector<8x16xf32>
    %73 = arith.addf %70, %72 : vector<8x16xf32>
    %cst_54 = arith.constant dense<0.000000e+00> : vector<8x8xf32>
    %74 = tpu.matmul %73, %27, %cst_54 {dimension_numbers = #tpu.dot_dimension_numbers<[1], [1], [0], [0], [0, 0, 1, 0], [], []>} : vector<8x16xf32>, vector<8x16xf32>, vector<8x8xf32> -> vector<8x8xf32>
    %cst_55 = arith.constant 2.500000e-01 : f32
    %75 = vector.broadcast %cst_55 : f32 to vector<8x8xf32>
    %76 = arith.mulf %74, %75 : vector<8x8xf32>
    %cst_56 = arith.constant -1.000000e+30 : f32
    %77 = vector.broadcast %cst_56 : f32 to vector<8x8xf32>
    %78 = arith.select %21, %76, %77 : vector<8x8xi1>, vector<8x8xf32>
    %cst_57 = arith.constant dense<0xFF800000> : vector<8xf32>
    %79 = vector.multi_reduction <maximumf>, %78, %cst_57 [1] : vector<8x8xf32> to vector<8xf32>
    %80 = vector.shape_cast %79 : vector<8xf32> to vector<8x1xf32>
    %81 = vector.broadcast %80 : vector<8x1xf32> to vector<8x8xf32>
    %82 = arith.subf %78, %81 : vector<8x8xf32>
    %83 = math.exp %82 : vector<8x8xf32>
    %cst_58 = arith.constant dense<0.000000e+00> : vector<8xf32>
    %84 = vector.multi_reduction <add>, %83, %cst_58 [1] : vector<8x8xf32> to vector<8xf32>
    %85 = vector.shape_cast %84 : vector<8xf32> to vector<8x1xf32>
    %86 = vector.broadcast %85 : vector<8x1xf32> to vector<8x8xf32>
    %87 = arith.divf %83, %86 : vector<8x8xf32>
    %cst_59 = arith.constant dense<0.000000e+00> : vector<8x16xf32>
    %88 = tpu.matmul %87, %29, %cst_59 {dimension_numbers = #tpu.dot_dimension_numbers<[1], [0], [0], [1], [0, 0, 1, 1], [], []>} : vector<8x8xf32>, vector<8x16xf32>, vector<8x16xf32> -> vector<8x16xf32>
    %c0_60 = arith.constant 0 : index
    %c1_61 = arith.constant 1 : index
    %c0_62 = arith.constant 0 : index
    %c0_63 = arith.constant 0 : index
    %89 = vector.load %arg6[%c0_60, %c1_61, %c0_62, %c0_63] : memref<1x4x8x16xf32, #tpu.memory_space<vmem>>, vector<1x1x8x16xf32>
    %90 = vector.shape_cast %89 : vector<1x1x8x16xf32> to vector<8x16xf32>
    %91 = vector.shape_cast %88 : vector<8x16xf32> to vector<1x1x8x16xf32>
    tpu.vector_store %arg6[%c0_60, %c1_61, %c0_62, %c0_63], %91 {strides = array<i32>} : memref<1x4x8x16xf32, #tpu.memory_space<vmem>>, vector<1x1x8x16xf32>,
    %c0_64 = arith.constant 0 : index
    %c2 = arith.constant 2 : index
    %c0_65 = arith.constant 0 : index
    %c0_66 = arith.constant 0 : index
    %92 = vector.load %arg1[%c0_64, %c2, %c0_65, %c0_66] : memref<1x4x8x16xf32, #tpu.memory_space<vmem>>, vector<1x1x8x16xf32>
    %93 = vector.shape_cast %92 : vector<1x1x8x16xf32> to vector<8x16xf32>
    %94 = arith.mulf %93, %1 : vector<8x16xf32>
    %cst_67 = arith.constant dense<0.000000e+00> : vector<8x16xf32>
    %95 = tpu.matmul %93, %18, %cst_67 {dimension_numbers = #tpu.dot_dimension_numbers<[1], [0], [0], [1], [0, 0, 1, 1], [], []>} : vector<8x16xf32>, vector<16x16xf32>, vector<8x16xf32> -> vector<8x16xf32>
    %96 = arith.mulf %95, %3 : vector<8x16xf32>
    %97 = arith.addf %94, %96 : vector<8x16xf32>
    %cst_68 = arith.constant dense<0.000000e+00> : vector<8x8xf32>
    %98 = tpu.matmul %97, %38, %cst_68 {dimension_numbers = #tpu.dot_dimension_numbers<[1], [1], [0], [0], [0, 0, 1, 0], [], []>} : vector<8x16xf32>, vector<8x16xf32>, vector<8x8xf32> -> vector<8x8xf32>
    %cst_69 = arith.constant 2.500000e-01 : f32
    %99 = vector.broadcast %cst_69 : f32 to vector<8x8xf32>
    %100 = arith.mulf %98, %99 : vector<8x8xf32>
    %cst_70 = arith.constant -1.000000e+30 : f32
    %101 = vector.broadcast %cst_70 : f32 to vector<8x8xf32>
    %102 = arith.select %21, %100, %101 : vector<8x8xi1>, vector<8x8xf32>
    %cst_71 = arith.constant dense<0xFF800000> : vector<8xf32>
    %103 = vector.multi_reduction <maximumf>, %102, %cst_71 [1] : vector<8x8xf32> to vector<8xf32>
    %104 = vector.shape_cast %103 : vector<8xf32> to vector<8x1xf32>
    %105 = vector.broadcast %104 : vector<8x1xf32> to vector<8x8xf32>
    %106 = arith.subf %102, %105 : vector<8x8xf32>
    %107 = math.exp %106 : vector<8x8xf32>
    %cst_72 = arith.constant dense<0.000000e+00> : vector<8xf32>
    %108 = vector.multi_reduction <add>, %107, %cst_72 [1] : vector<8x8xf32> to vector<8xf32>
    %109 = vector.shape_cast %108 : vector<8xf32> to vector<8x1xf32>
    %110 = vector.broadcast %109 : vector<8x1xf32> to vector<8x8xf32>
    %111 = arith.divf %107, %110 : vector<8x8xf32>
    %cst_73 = arith.constant dense<0.000000e+00> : vector<8x16xf32>
    %112 = tpu.matmul %111, %40, %cst_73 {dimension_numbers = #tpu.dot_dimension_numbers<[1], [0], [0], [1], [0, 0, 1, 1], [], []>} : vector<8x8xf32>, vector<8x16xf32>, vector<8x16xf32> -> vector<8x16xf32>
    %c0_74 = arith.constant 0 : index
    %c2_75 = arith.constant 2 : index
    %c0_76 = arith.constant 0 : index
    %c0_77 = arith.constant 0 : index
    %113 = vector.load %arg6[%c0_74, %c2_75, %c0_76, %c0_77] : memref<1x4x8x16xf32, #tpu.memory_space<vmem>>, vector<1x1x8x16xf32>
    %114 = vector.shape_cast %113 : vector<1x1x8x16xf32> to vector<8x16xf32>
    %115 = vector.shape_cast %112 : vector<8x16xf32> to vector<1x1x8x16xf32>
    tpu.vector_store %arg6[%c0_74, %c2_75, %c0_76, %c0_77], %115 {strides = array<i32>} : memref<1x4x8x16xf32, #tpu.memory_space<vmem>>, vector<1x1x8x16xf32>,
    %c0_78 = arith.constant 0 : index
    %c3 = arith.constant 3 : index
    %c0_79 = arith.constant 0 : index
    %c0_80 = arith.constant 0 : index
    %116 = vector.load %arg1[%c0_78, %c3, %c0_79, %c0_80] : memref<1x4x8x16xf32, #tpu.memory_space<vmem>>, vector<1x1x8x16xf32>
    %117 = vector.shape_cast %116 : vector<1x1x8x16xf32> to vector<8x16xf32>
    %118 = arith.mulf %117, %1 : vector<8x16xf32>
    %cst_81 = arith.constant dense<0.000000e+00> : vector<8x16xf32>
    %119 = tpu.matmul %117, %18, %cst_81 {dimension_numbers = #tpu.dot_dimension_numbers<[1], [0], [0], [1], [0, 0, 1, 1], [], []>} : vector<8x16xf32>, vector<16x16xf32>, vector<8x16xf32> -> vector<8x16xf32>
    %120 = arith.mulf %119, %3 : vector<8x16xf32>
    %121 = arith.addf %118, %120 : vector<8x16xf32>
    %cst_82 = arith.constant dense<0.000000e+00> : vector<8x8xf32>
    %122 = tpu.matmul %121, %38, %cst_82 {dimension_numbers = #tpu.dot_dimension_numbers<[1], [1], [0], [0], [0, 0, 1, 0], [], []>} : vector<8x16xf32>, vector<8x16xf32>, vector<8x8xf32> -> vector<8x8xf32>
    %cst_83 = arith.constant 2.500000e-01 : f32
    %123 = vector.broadcast %cst_83 : f32 to vector<8x8xf32>
    %124 = arith.mulf %122, %123 : vector<8x8xf32>
    %cst_84 = arith.constant -1.000000e+30 : f32
    %125 = vector.broadcast %cst_84 : f32 to vector<8x8xf32>
    %126 = arith.select %21, %124, %125 : vector<8x8xi1>, vector<8x8xf32>
    %cst_85 = arith.constant dense<0xFF800000> : vector<8xf32>
    %127 = vector.multi_reduction <maximumf>, %126, %cst_85 [1] : vector<8x8xf32> to vector<8xf32>
    %128 = vector.shape_cast %127 : vector<8xf32> to vector<8x1xf32>
    %129 = vector.broadcast %128 : vector<8x1xf32> to vector<8x8xf32>
    %130 = arith.subf %126, %129 : vector<8x8xf32>
    %131 = math.exp %130 : vector<8x8xf32>
    %cst_86 = arith.constant dense<0.000000e+00> : vector<8xf32>
    %132 = vector.multi_reduction <add>, %131, %cst_86 [1] : vector<8x8xf32> to vector<8xf32>
    %133 = vector.shape_cast %132 : vector<8xf32> to vector<8x1xf32>
    %134 = vector.broadcast %133 : vector<8x1xf32> to vector<8x8xf32>
    %135 = arith.divf %131, %134 : vector<8x8xf32>
    %cst_87 = arith.constant dense<0.000000e+00> : vector<8x16xf32>
    %136 = tpu.matmul %135, %40, %cst_87 {dimension_numbers = #tpu.dot_dimension_numbers<[1], [0], [0], [1], [0, 0, 1, 1], [], []>} : vector<8x8xf32>, vector<8x16xf32>, vector<8x16xf32> -> vector<8x16xf32>
    %c0_88 = arith.constant 0 : index
    %c3_89 = arith.constant 3 : index
    %c0_90 = arith.constant 0 : index
    %c0_91 = arith.constant 0 : index
    %137 = vector.load %arg6[%c0_88, %c3_89, %c0_90, %c0_91] : memref<1x4x8x16xf32, #tpu.memory_space<vmem>>, vector<1x1x8x16xf32>
    %138 = vector.shape_cast %137 : vector<1x1x8x16xf32> to vector<8x16xf32>
    %139 = vector.shape_cast %136 : vector<8x16xf32> to vector<1x1x8x16xf32>
    tpu.vector_store %arg6[%c0_88, %c3_89, %c0_90, %c0_91], %139 {strides = array<i32>} : memref<1x4x8x16xf32, #tpu.memory_space<vmem>>, vector<1x1x8x16xf32>,
    return
  }
  func.func @transform_0(%arg0: i32) -> (i32, i32, i32, i32) {
    %c0_i32 = arith.constant 0 : i32
    %c0_i32_0 = arith.constant 0 : i32
    %c0_i32_1 = arith.constant 0 : i32
    %c0_i32_2 = arith.constant 0 : i32
    return %arg0, %c0_i32, %c0_i32_0, %c0_i32_1 : i32, i32, i32, i32
  }
  func.func @transform_1(%arg0: i32) -> (i32, i32, i32, i32) {
    %c0_i32 = arith.constant 0 : i32
    %c0_i32_0 = arith.constant 0 : i32
    %c0_i32_1 = arith.constant 0 : i32
    %c0_i32_2 = arith.constant 0 : i32
    return %arg0, %c0_i32, %c0_i32_0, %c0_i32_1 : i32, i32, i32, i32
  }
  func.func @transform_2(%arg0: i32) -> (i32, i32, i32, i32) {
    %c0_i32 = arith.constant 0 : i32
    %c0_i32_0 = arith.constant 0 : i32
    %c0_i32_1 = arith.constant 0 : i32
    %c0_i32_2 = arith.constant 0 : i32
    return %arg0, %c0_i32, %c0_i32_0, %c0_i32_1 : i32, i32, i32, i32
  }
  func.func @transform_3(%arg0: i32) -> (i32, i32, i32) {
    %c0_i32 = arith.constant 0 : i32
    %c0_i32_0 = arith.constant 0 : i32
    %c0_i32_1 = arith.constant 0 : i32
    return %arg0, %c0_i32, %c0_i32_0 : i32, i32, i32
  }
  func.func @transform_4(%arg0: i32) -> (i32, i32, i32) {
    %c0_i32 = arith.constant 0 : i32
    %c0_i32_0 = arith.constant 0 : i32
    %c0_i32_1 = arith.constant 0 : i32
    return %arg0, %c0_i32, %c0_i32_0 : i32, i32, i32
  }
  func.func @transform_5(%arg0: i32) -> (i32, i32, i32, i32) {
    %c0_i32 = arith.constant 0 : i32
    %c0_i32_0 = arith.constant 0 : i32
    %c0_i32_1 = arith.constant 0 : i32
    %c0_i32_2 = arith.constant 0 : i32
    return %arg0, %c0_i32, %c0_i32_0, %c0_i32_1 : i32, i32, i32, i32
  }
  func.func @transform_6(%arg0: i32) -> (i32, i32, i32, i32) {
    %c0_i32 = arith.constant 0 : i32
    %c0_i32_0 = arith.constant 0 : i32
    %c0_i32_1 = arith.constant 0 : i32
    %c0_i32_2 = arith.constant 0 : i32
    return %arg0, %c0_i32, %c0_i32_0, %c0_i32_1 : i32, i32, i32, i32
  }
}

module attributes {stable_mosaic.version = 11 : i64} {
  func.func @_matmul_residual_kernel(%arg0: i32, %arg1: i32, %arg2: i32, %arg3: memref<16x64xf32, #tpu.memory_space<vmem>>, %arg4: memref<64x64xf32, #tpu.memory_space<vmem>>, %arg5: memref<16x64xf32, #tpu.memory_space<vmem>>, %arg6: memref<16x64xf32, #tpu.memory_space<vmem>>, %arg7: memref<16x64xf32, #tpu.memory_space<vmem>>) attributes {dimension_semantics = [#tpu.dimension_semantics<parallel>, #tpu.dimension_semantics<parallel>, #tpu.dimension_semantics<arbitrary>], iteration_bounds = array<i64: 1, 1, 1>, scalar_prefetch = 0 : i64, scratch_operands = 1 : i64, tpu.core_type = #tpu.core_type<tc>, window_params = [{transform_indices = @transform_0, window_bounds = array<i64: 16, 64>}, {transform_indices = @transform_1, window_bounds = array<i64: 64, 64>}, {transform_indices = @transform_2, window_bounds = array<i64: 16, 64>}, {transform_indices = @transform_3, window_bounds = array<i64: 16, 64>}]} {
    %c0_i32 = arith.constant 0 : i32
    %0 = arith.cmpi eq, %arg2, %c0_i32 : i32
    %1 = arith.extui %0 : i1 to i32
    %c0_i32_0 = arith.constant 0 : i32
    %2 = arith.cmpi ne, %1, %c0_i32_0 : i32
    scf.if %2 {
      %cst_10 = arith.constant 0.000000e+00 : f32
      %12 = vector.broadcast %cst_10 : f32 to vector<16x64xf32>
      %c0_11 = arith.constant 0 : index
      %c0_12 = arith.constant 0 : index
      %13 = vector.load %arg7[%c0_11, %c0_12] : memref<16x64xf32, #tpu.memory_space<vmem>>, vector<16x64xf32>
      tpu.vector_store %arg7[%c0_11, %c0_12], %12 {strides = array<i32>} : memref<16x64xf32, #tpu.memory_space<vmem>>, vector<16x64xf32>,
    } else {
    }
    %c0 = arith.constant 0 : index
    %c0_1 = arith.constant 0 : index
    %3 = vector.load %arg7[%c0, %c0_1] : memref<16x64xf32, #tpu.memory_space<vmem>>, vector<16x64xf32>
    %c0_2 = arith.constant 0 : index
    %c0_3 = arith.constant 0 : index
    %4 = vector.load %arg3[%c0_2, %c0_3] : memref<16x64xf32, #tpu.memory_space<vmem>>, vector<16x64xf32>
    %c0_4 = arith.constant 0 : index
    %c0_5 = arith.constant 0 : index
    %5 = vector.load %arg4[%c0_4, %c0_5] : memref<64x64xf32, #tpu.memory_space<vmem>>, vector<64x64xf32>
    %cst = arith.constant dense<0.000000e+00> : vector<16x64xf32>
    %6 = tpu.matmul %4, %5, %cst {dimension_numbers = #tpu.dot_dimension_numbers<[1], [0], [0], [1], [0, 0, 1, 1], [], []>} : vector<16x64xf32>, vector<64x64xf32>, vector<16x64xf32> -> vector<16x64xf32>
    %7 = arith.addf %3, %6 : vector<16x64xf32>
    %c0_6 = arith.constant 0 : index
    %c0_7 = arith.constant 0 : index
    %8 = vector.load %arg7[%c0_6, %c0_7] : memref<16x64xf32, #tpu.memory_space<vmem>>, vector<16x64xf32>
    tpu.vector_store %arg7[%c0_6, %c0_7], %7 {strides = array<i32>} : memref<16x64xf32, #tpu.memory_space<vmem>>, vector<16x64xf32>,
    %c0_i32_8 = arith.constant 0 : i32
    %9 = arith.cmpi eq, %arg2, %c0_i32_8 : i32
    %10 = arith.extui %9 : i1 to i32
    %c0_i32_9 = arith.constant 0 : i32
    %11 = arith.cmpi ne, %10, %c0_i32_9 : i32
    scf.if %11 {
      %c0_10 = arith.constant 0 : index
      %c0_11 = arith.constant 0 : index
      %12 = vector.load %arg7[%c0_10, %c0_11] : memref<16x64xf32, #tpu.memory_space<vmem>>, vector<16x64xf32>
      %c0_12 = arith.constant 0 : index
      %c0_13 = arith.constant 0 : index
      %13 = vector.load %arg5[%c0_12, %c0_13] : memref<16x64xf32, #tpu.memory_space<vmem>>, vector<16x64xf32>
      %14 = arith.addf %12, %13 : vector<16x64xf32>
      %c0_14 = arith.constant 0 : index
      %c0_15 = arith.constant 0 : index
      %15 = vector.load %arg6[%c0_14, %c0_15] : memref<16x64xf32, #tpu.memory_space<vmem>>, vector<16x64xf32>
      tpu.vector_store %arg6[%c0_14, %c0_15], %14 {strides = array<i32>} : memref<16x64xf32, #tpu.memory_space<vmem>>, vector<16x64xf32>,
    } else {
    }
    return
  }
  func.func @transform_0(%arg0: i32, %arg1: i32, %arg2: i32) -> (i32, i32) {
    %c0_i32 = arith.constant 0 : i32
    return %arg0, %arg2 : i32, i32
  }
  func.func @transform_1(%arg0: i32, %arg1: i32, %arg2: i32) -> (i32, i32) {
    %c0_i32 = arith.constant 0 : i32
    return %arg2, %arg1 : i32, i32
  }
  func.func @transform_2(%arg0: i32, %arg1: i32, %arg2: i32) -> (i32, i32) {
    %c0_i32 = arith.constant 0 : i32
    return %arg0, %arg1 : i32, i32
  }
  func.func @transform_3(%arg0: i32, %arg1: i32, %arg2: i32) -> (i32, i32) {
    %c0_i32 = arith.constant 0 : i32
    return %arg0, %arg1 : i32, i32
  }
}

module attributes {stable_mosaic.version = 11 : i64} {
  func.func @_ln_router_kernel(%arg0: i32, %arg1: memref<16x64xf32, #tpu.memory_space<vmem>>, %arg2: memref<1x64xf32, #tpu.memory_space<vmem>>, %arg3: memref<64x4xf32, #tpu.memory_space<vmem>>, %arg4: memref<16x64xf32, #tpu.memory_space<vmem>>, %arg5: memref<16x4xf32, #tpu.memory_space<vmem>>) attributes {dimension_semantics = [#tpu.dimension_semantics<parallel>], iteration_bounds = array<i64: 1>, scalar_prefetch = 0 : i64, scratch_operands = 0 : i64, tpu.core_type = #tpu.core_type<tc>, window_params = [{transform_indices = @transform_0, window_bounds = array<i64: 16, 64>}, {pipeline_mode = #tpu.pipeline_mode<synchronous>, transform_indices = @transform_1, window_bounds = array<i64: 1, 64>}, {pipeline_mode = #tpu.pipeline_mode<synchronous>, transform_indices = @transform_2, window_bounds = array<i64: 64, 4>}, {transform_indices = @transform_3, window_bounds = array<i64: 16, 64>}, {transform_indices = @transform_4, window_bounds = array<i64: 16, 4>}]} {
    %c0 = arith.constant 0 : index
    %c0_0 = arith.constant 0 : index
    %0 = vector.load %arg1[%c0, %c0_0] : memref<16x64xf32, #tpu.memory_space<vmem>>, vector<16x64xf32>
    %cst = arith.constant dense<0.000000e+00> : vector<16xf32>
    %1 = vector.multi_reduction <add>, %0, %cst [1] : vector<16x64xf32> to vector<16xf32>
    %2 = vector.shape_cast %1 : vector<16xf32> to vector<16x1xf32>
    %cst_1 = arith.constant 6.400000e+01 : f32
    %3 = vector.broadcast %cst_1 : f32 to vector<16x1xf32>
    %4 = arith.divf %2, %3 : vector<16x1xf32>
    %5 = vector.broadcast %4 : vector<16x1xf32> to vector<16x64xf32>
    %6 = arith.subf %0, %5 : vector<16x64xf32>
    %7 = arith.mulf %6, %6 : vector<16x64xf32>
    %cst_2 = arith.constant dense<0.000000e+00> : vector<16xf32>
    %8 = vector.multi_reduction <add>, %7, %cst_2 [1] : vector<16x64xf32> to vector<16xf32>
    %9 = vector.shape_cast %8 : vector<16xf32> to vector<16x1xf32>
    %cst_3 = arith.constant 6.400000e+01 : f32
    %10 = vector.broadcast %cst_3 : f32 to vector<16x1xf32>
    %11 = arith.divf %9, %10 : vector<16x1xf32>
    %12 = vector.broadcast %4 : vector<16x1xf32> to vector<16x64xf32>
    %13 = arith.subf %0, %12 : vector<16x64xf32>
    %cst_4 = arith.constant 9.99999974E-6 : f32
    %14 = vector.broadcast %cst_4 : f32 to vector<16x1xf32>
    %15 = arith.addf %11, %14 : vector<16x1xf32>
    %16 = math.rsqrt %15 : vector<16x1xf32>
    %17 = vector.broadcast %16 : vector<16x1xf32> to vector<16x64xf32>
    %18 = arith.mulf %13, %17 : vector<16x64xf32>
    %c0_5 = arith.constant 0 : index
    %c0_6 = arith.constant 0 : index
    %19 = vector.load %arg2[%c0_5, %c0_6] : memref<1x64xf32, #tpu.memory_space<vmem>>, vector<1x64xf32>
    %20 = vector.broadcast %19 : vector<1x64xf32> to vector<16x64xf32>
    %21 = arith.mulf %18, %20 : vector<16x64xf32>
    %c0_7 = arith.constant 0 : index
    %c0_8 = arith.constant 0 : index
    %22 = vector.load %arg4[%c0_7, %c0_8] : memref<16x64xf32, #tpu.memory_space<vmem>>, vector<16x64xf32>
    tpu.vector_store %arg4[%c0_7, %c0_8], %21 {strides = array<i32>} : memref<16x64xf32, #tpu.memory_space<vmem>>, vector<16x64xf32>,
    %c0_9 = arith.constant 0 : index
    %c0_10 = arith.constant 0 : index
    %23 = vector.load %arg3[%c0_9, %c0_10] : memref<64x4xf32, #tpu.memory_space<vmem>>, vector<64x4xf32>
    %cst_11 = arith.constant dense<0.000000e+00> : vector<16x4xf32>
    %24 = tpu.matmul %21, %23, %cst_11 {dimension_numbers = #tpu.dot_dimension_numbers<[1], [0], [0], [1], [0, 0, 1, 1], [], []>} : vector<16x64xf32>, vector<64x4xf32>, vector<16x4xf32> -> vector<16x4xf32>
    %cst_12 = arith.constant dense<0xFF800000> : vector<16xf32>
    %25 = vector.multi_reduction <maximumf>, %24, %cst_12 [1] : vector<16x4xf32> to vector<16xf32>
    %26 = vector.shape_cast %25 : vector<16xf32> to vector<16x1xf32>
    %27 = vector.broadcast %26 : vector<16x1xf32> to vector<16x4xf32>
    %28 = arith.subf %24, %27 : vector<16x4xf32>
    %29 = math.exp %28 : vector<16x4xf32>
    %cst_13 = arith.constant dense<0.000000e+00> : vector<16xf32>
    %30 = vector.multi_reduction <add>, %29, %cst_13 [1] : vector<16x4xf32> to vector<16xf32>
    %31 = vector.shape_cast %30 : vector<16xf32> to vector<16x1xf32>
    %32 = vector.broadcast %31 : vector<16x1xf32> to vector<16x4xf32>
    %33 = arith.divf %29, %32 : vector<16x4xf32>
    %c0_14 = arith.constant 0 : index
    %c0_15 = arith.constant 0 : index
    %34 = vector.load %arg5[%c0_14, %c0_15] : memref<16x4xf32, #tpu.memory_space<vmem>>, vector<16x4xf32>
    tpu.vector_store %arg5[%c0_14, %c0_15], %33 {strides = array<i32>} : memref<16x4xf32, #tpu.memory_space<vmem>>, vector<16x4xf32>,
    return
  }
  func.func @transform_0(%arg0: i32) -> (i32, i32) {
    %c0_i32 = arith.constant 0 : i32
    %c0_i32_0 = arith.constant 0 : i32
    return %arg0, %c0_i32 : i32, i32
  }
  func.func @transform_1(%arg0: i32) -> (i32, i32) {
    %c0_i32 = arith.constant 0 : i32
    %c0_i32_0 = arith.constant 0 : i32
    %c0_i32_1 = arith.constant 0 : i32
    return %c0_i32, %c0_i32_0 : i32, i32
  }
  func.func @transform_2(%arg0: i32) -> (i32, i32) {
    %c0_i32 = arith.constant 0 : i32
    %c0_i32_0 = arith.constant 0 : i32
    %c0_i32_1 = arith.constant 0 : i32
    return %c0_i32, %c0_i32_0 : i32, i32
  }
  func.func @transform_3(%arg0: i32) -> (i32, i32) {
    %c0_i32 = arith.constant 0 : i32
    %c0_i32_0 = arith.constant 0 : i32
    return %arg0, %c0_i32 : i32, i32
  }
  func.func @transform_4(%arg0: i32) -> (i32, i32) {
    %c0_i32 = arith.constant 0 : i32
    %c0_i32_0 = arith.constant 0 : i32
    return %arg0, %c0_i32 : i32, i32
  }
}

module attributes {stable_mosaic.version = 11 : i64} {
  func.func @_moe_kernel(%arg0: i32, %arg1: i32, %arg2: memref<16x64xf32, #tpu.memory_space<vmem>>, %arg3: memref<16x64xf32, #tpu.memory_space<vmem>>, %arg4: memref<1x64x128xf32, #tpu.memory_space<vmem>>, %arg5: memref<1x64x128xf32, #tpu.memory_space<vmem>>, %arg6: memref<1x128x64xf32, #tpu.memory_space<vmem>>, %arg7: memref<1x16x1xf32, #tpu.memory_space<vmem>>, %arg8: memref<16x64xf32, #tpu.memory_space<vmem>>, %arg9: memref<16x64xf32, #tpu.memory_space<vmem>>) attributes {dimension_semantics = [#tpu.dimension_semantics<parallel>, #tpu.dimension_semantics<arbitrary>], iteration_bounds = array<i64: 1, 4>, scalar_prefetch = 0 : i64, scratch_operands = 1 : i64, tpu.core_type = #tpu.core_type<tc>, window_params = [{transform_indices = @transform_0, window_bounds = array<i64: 16, 64>}, {transform_indices = @transform_1, window_bounds = array<i64: 16, 64>}, {transform_indices = @transform_2, window_bounds = array<i64: 1, 64, 128>}, {transform_indices = @transform_3, window_bounds = array<i64: 1, 64, 128>}, {transform_indices = @transform_4, window_bounds = array<i64: 1, 128, 64>}, {transform_indices = @transform_5, window_bounds = array<i64: 1, 16, 1>}, {transform_indices = @transform_6, window_bounds = array<i64: 16, 64>}]} {
    %c0_i32 = arith.constant 0 : i32
    %0 = arith.cmpi eq, %arg1, %c0_i32 : i32
    %1 = arith.extui %0 : i1 to i32
    %c0_i32_0 = arith.constant 0 : i32
    %2 = arith.cmpi ne, %1, %c0_i32_0 : i32
    scf.if %2 {
      %cst_22 = arith.constant 0.000000e+00 : f32
      %30 = vector.broadcast %cst_22 : f32 to vector<16x64xf32>
      %c0_23 = arith.constant 0 : index
      %c0_24 = arith.constant 0 : index
      %31 = vector.load %arg9[%c0_23, %c0_24] : memref<16x64xf32, #tpu.memory_space<vmem>>, vector<16x64xf32>
      tpu.vector_store %arg9[%c0_23, %c0_24], %30 {strides = array<i32>} : memref<16x64xf32, #tpu.memory_space<vmem>>, vector<16x64xf32>,
    } else {
    }
    %c0 = arith.constant 0 : index
    %c0_1 = arith.constant 0 : index
    %3 = vector.load %arg2[%c0, %c0_1] : memref<16x64xf32, #tpu.memory_space<vmem>>, vector<16x64xf32>
    %c0_2 = arith.constant 0 : index
    %c0_3 = arith.constant 0 : index
    %c0_4 = arith.constant 0 : index
    %4 = vector.load %arg4[%c0_2, %c0_3, %c0_4] : memref<1x64x128xf32, #tpu.memory_space<vmem>>, vector<1x64x128xf32>
    %5 = vector.shape_cast %4 : vector<1x64x128xf32> to vector<64x128xf32>
    %cst = arith.constant dense<0.000000e+00> : vector<16x128xf32>
    %6 = tpu.matmul %3, %5, %cst {dimension_numbers = #tpu.dot_dimension_numbers<[1], [0], [0], [1], [0, 0, 1, 1], [], []>} : vector<16x64xf32>, vector<64x128xf32>, vector<16x128xf32> -> vector<16x128xf32>
    %c0_5 = arith.constant 0 : index
    %c0_6 = arith.constant 0 : index
    %c0_7 = arith.constant 0 : index
    %7 = vector.load %arg5[%c0_5, %c0_6, %c0_7] : memref<1x64x128xf32, #tpu.memory_space<vmem>>, vector<1x64x128xf32>
    %8 = vector.shape_cast %7 : vector<1x64x128xf32> to vector<64x128xf32>
    %cst_8 = arith.constant dense<0.000000e+00> : vector<16x128xf32>
    %9 = tpu.matmul %3, %8, %cst_8 {dimension_numbers = #tpu.dot_dimension_numbers<[1], [0], [0], [1], [0, 0, 1, 1], [], []>} : vector<16x64xf32>, vector<64x128xf32>, vector<16x128xf32> -> vector<16x128xf32>
    %10 = arith.negf %6 : vector<16x128xf32>
    %11 = math.exp %10 : vector<16x128xf32>
    %cst_9 = arith.constant 1.000000e+00 : f32
    %12 = vector.broadcast %cst_9 : f32 to vector<16x128xf32>
    %13 = arith.addf %12, %11 : vector<16x128xf32>
    %14 = arith.divf %12, %13 : vector<16x128xf32>
    %15 = arith.mulf %6, %14 : vector<16x128xf32>
    %16 = arith.mulf %15, %9 : vector<16x128xf32>
    %c0_10 = arith.constant 0 : index
    %c0_11 = arith.constant 0 : index
    %c0_12 = arith.constant 0 : index
    %17 = vector.load %arg6[%c0_10, %c0_11, %c0_12] : memref<1x128x64xf32, #tpu.memory_space<vmem>>, vector<1x128x64xf32>
    %18 = vector.shape_cast %17 : vector<1x128x64xf32> to vector<128x64xf32>
    %cst_13 = arith.constant dense<0.000000e+00> : vector<16x64xf32>
    %19 = tpu.matmul %16, %18, %cst_13 {dimension_numbers = #tpu.dot_dimension_numbers<[1], [0], [0], [1], [0, 0, 1, 1], [], []>} : vector<16x128xf32>, vector<128x64xf32>, vector<16x64xf32> -> vector<16x64xf32>
    %c0_14 = arith.constant 0 : index
    %c0_15 = arith.constant 0 : index
    %20 = vector.load %arg9[%c0_14, %c0_15] : memref<16x64xf32, #tpu.memory_space<vmem>>, vector<16x64xf32>
    %c0_16 = arith.constant 0 : index
    %c0_17 = arith.constant 0 : index
    %c0_18 = arith.constant 0 : index
    %21 = vector.load %arg7[%c0_16, %c0_17, %c0_18] : memref<1x16x1xf32, #tpu.memory_space<vmem>>, vector<1x16x1xf32>
    %22 = vector.shape_cast %21 : vector<1x16x1xf32> to vector<16x1xf32>
    %23 = vector.broadcast %22 : vector<16x1xf32> to vector<16x64xf32>
    %24 = arith.mulf %19, %23 : vector<16x64xf32>
    %25 = arith.addf %20, %24 : vector<16x64xf32>
    %c0_19 = arith.constant 0 : index
    %c0_20 = arith.constant 0 : index
    %26 = vector.load %arg9[%c0_19, %c0_20] : memref<16x64xf32, #tpu.memory_space<vmem>>, vector<16x64xf32>
    tpu.vector_store %arg9[%c0_19, %c0_20], %25 {strides = array<i32>} : memref<16x64xf32, #tpu.memory_space<vmem>>, vector<16x64xf32>,
    %c3_i32 = arith.constant 3 : i32
    %27 = arith.cmpi eq, %arg1, %c3_i32 : i32
    %28 = arith.extui %27 : i1 to i32
    %c0_i32_21 = arith.constant 0 : i32
    %29 = arith.cmpi ne, %28, %c0_i32_21 : i32
    scf.if %29 {
      %c0_22 = arith.constant 0 : index
      %c0_23 = arith.constant 0 : index
      %30 = vector.load %arg9[%c0_22, %c0_23] : memref<16x64xf32, #tpu.memory_space<vmem>>, vector<16x64xf32>
      %c0_24 = arith.constant 0 : index
      %c0_25 = arith.constant 0 : index
      %31 = vector.load %arg3[%c0_24, %c0_25] : memref<16x64xf32, #tpu.memory_space<vmem>>, vector<16x64xf32>
      %32 = arith.addf %30, %31 : vector<16x64xf32>
      %c0_26 = arith.constant 0 : index
      %c0_27 = arith.constant 0 : index
      %33 = vector.load %arg8[%c0_26, %c0_27] : memref<16x64xf32, #tpu.memory_space<vmem>>, vector<16x64xf32>
      tpu.vector_store %arg8[%c0_26, %c0_27], %32 {strides = array<i32>} : memref<16x64xf32, #tpu.memory_space<vmem>>, vector<16x64xf32>,
    } else {
    }
    return
  }
  func.func @transform_0(%arg0: i32, %arg1: i32) -> (i32, i32) {
    %c0_i32 = arith.constant 0 : i32
    %c0_i32_0 = arith.constant 0 : i32
    return %arg0, %c0_i32 : i32, i32
  }
  func.func @transform_1(%arg0: i32, %arg1: i32) -> (i32, i32) {
    %c0_i32 = arith.constant 0 : i32
    %c0_i32_0 = arith.constant 0 : i32
    return %arg0, %c0_i32 : i32, i32
  }
  func.func @transform_2(%arg0: i32, %arg1: i32) -> (i32, i32, i32) {
    %c0_i32 = arith.constant 0 : i32
    %c0_i32_0 = arith.constant 0 : i32
    %c0_i32_1 = arith.constant 0 : i32
    return %arg1, %c0_i32, %c0_i32_0 : i32, i32, i32
  }
  func.func @transform_3(%arg0: i32, %arg1: i32) -> (i32, i32, i32) {
    %c0_i32 = arith.constant 0 : i32
    %c0_i32_0 = arith.constant 0 : i32
    %c0_i32_1 = arith.constant 0 : i32
    return %arg1, %c0_i32, %c0_i32_0 : i32, i32, i32
  }
  func.func @transform_4(%arg0: i32, %arg1: i32) -> (i32, i32, i32) {
    %c0_i32 = arith.constant 0 : i32
    %c0_i32_0 = arith.constant 0 : i32
    %c0_i32_1 = arith.constant 0 : i32
    return %arg1, %c0_i32, %c0_i32_0 : i32, i32, i32
  }
  func.func @transform_5(%arg0: i32, %arg1: i32) -> (i32, i32, i32) {
    %c0_i32 = arith.constant 0 : i32
    %c0_i32_0 = arith.constant 0 : i32
    return %arg1, %arg0, %c0_i32 : i32, i32, i32
  }
  func.func @transform_6(%arg0: i32, %arg1: i32) -> (i32, i32) {
    %c0_i32 = arith.constant 0 : i32
    %c0_i32_0 = arith.constant 0 : i32
    return %arg0, %c0_i32 : i32, i32
  }
}

</mosaic_0001>

<bundles_post_ra>
// kernel: dbrx_block_forward.5
= control target key start
LH: loop header
LB: loop body
LE: loop exit
PB: predicated region body
PF: predicated region fallthrough
CT: control target
= control target key end

     0   :  { %8 = vsyncpa [#allocation3], 0  ;;  %s187_s15 = smov [#allocation2]   ;;  %s188_s17 = smov 128   ;;  %s235_s0 = inlined_call_operand.vmem [shape: f32[16,64], index: 0, kind: input, shape index: {}]   ;;  %s236_s1 = inlined_call_operand.vmem [shape: f32[1,64], index: 1, kind: input, shape index: {}]   ;;  %s237_s2 = inlined_call_operand.hbm [shape: f32[64,128], index: 2, kind: input, shape index: {}]   ;;  %s238_s3 = inlined_call_operand.vmem [shape: f32[16,128], index: 3, kind: output, shape index: {}]  }
   0x1   :  { %s17_s14 = sshll.u32 %s237_s2, 4  ;;  %s19_s16 = sshll.u32 %s187_s15, 4  ;;  %s18_s14 = int_to_ptr.hbm [resolvable:$true] %s17_s14  ;;  %s20_s16 = int_to_ptr.vmem [resolvable:$true] %s19_s16 }
   0x2   :  { %s189_s18 = smov 8  }
   0x3   :  { %25 = dma.hbm_to_vmem [thread:$0]  %s18_s14, 1024, %s20_s16, [#allocation3], %s188_s17, %s188_s17, %s189_s18  }
   0x4   :  { %185 = dma.done.wait [#allocation3], 1024  }
   0x5   :  { %186 = vsyncadd [#allocation3], 4294966272  ;;  %vm32_vm0 = vcmask 523264   ;;  %v30_v0 = vld [vmem:[%s235_s0] sm:$0xff]  ;;  %v31_v2 = vld [vmem:[%s235_s0 + $0x8] sm:$0xff]  ;;  %v190_v4 = vmov 64.0  }
   0x6   :  { %v33_v1 = vsel %vm32_vm0, %v30_v0, 0.0  ;;  %v36_v3 = vsel %vm32_vm0, %v31_v2, 0.0  ;;  %155 = vrcp.f32 %v190_v4  ;;  %v97_v21 = vld [vmem:[#allocation2 + $0x38] sm:$0xff]  ;;  %v96_v22 = vld [vmem:[#allocation2 + $0x30] sm:$0xff]  ;;  %v95_v23 = vld [vmem:[#allocation2 + $0x28] sm:$0xff] }
   0x7   :  { %34 = vadd.xlane.f32.xlu0 %v33_v1  ;;  %112 = vmatpush.msra.mxu0 %v97_v21  ;;  %v94_v24 = vld [vmem:[#allocation2 + $0x20] sm:$0xff]  ;;  %v93_v25 = vld [vmem:[#allocation2 + $0x18] sm:$0xff]  ;;  %v92_v26 = vld [vmem:[#allocation2 + $0x10] sm:$0xff] }
   0x8   :  { %142 = vmatpush.msra.mxu1 %v97_v21  ;;  %v91_v27 = vld [vmem:[#allocation2 + $0x8] sm:$0xff]  ;;  %v90_v28 = vld [vmem:[#allocation2] sm:$0xff] }
   0x9   :  { %113 = vmatpush.msra.mxu0 %v96_v22  ;;  %v154_v43 = vld [vmem:[%s236_s1] ss:$0 sm:$0xff] }
   0xa   :  { %143 = vmatpush.msra.mxu1 %v96_v22 }
   0xb   :  { %114 = vmatpush.msra.mxu0 %v95_v23 }
   0xc   :  { %v156_v5 = vpop.eup %155  ;;  %144 = vmatpush.msra.mxu1 %v95_v23 }
   0xd   :  { %v40_v6 = vmul.f32 64.0, %v156_v5  ;;  %vm44_vm1 = vweird.f32 %v156_v5  ;;  %115 = vmatpush.msra.mxu0 %v94_v24 }
   0xe   :  { %145 = vmatpush.msra.mxu1 %v94_v24 }
   0xf   :  { %37 = vadd.xlane.f32.xlu0 %v36_v3  ;;  %v41_v7 = vsub.f32 1.0, %v40_v6  ;;  %116 = vmatpush.msra.mxu0 %v93_v25 }
  0x10   :  { %146 = vmatpush.msra.mxu1 %v93_v25 }
  0x11   :  { %v42_v8 = vmul.f32 %v156_v5, %v41_v7  ;;  %117 = vmatpush.msra.mxu0 %v92_v26 }
  0x12   :  { %147 = vmatpush.msra.mxu1 %v92_v26 }
  0x13   :  { %v43_v9 = vadd.f32 %v156_v5, %v42_v8  ;;  %118 = vmatpush.msra.mxu0 %v91_v27 }
  0x14   :  { %148 = vmatpush.msra.mxu1 %v91_v27 }
  0x15   :  { %v45_v10 = vsel %vm44_vm1, %v156_v5, %v43_v9  ;;  %119 = vmatpush.msra.mxu0 %v90_v28 }
  0x16   :  { %149 = vmatpush.msra.mxu1 %v90_v28 }
  0x7a   :  { %v35_v11 = vpop.xlane.xlu0 %34 }
  0x7b   :  { %v46_v12 = vmul.f32 %v45_v10, %v35_v11 }
  0x7d   :  { %v48_v13 = vsub.f32 %v30_v0, %v46_v12 }
  0x7f   :  { %v50_v14 = vmul.f32 %v48_v13, %v48_v13 }
  0x81   :  { %v52_v15 = vsel %vm32_vm0, %v50_v14, 0.0 }
  0x82   :  { %53 = vadd.xlane.f32.xlu1 %v52_v15  ;;  %v38_v16 = vpop.xlane.xlu0 %37 }
  0x83   :  { %v47_v17 = vmul.f32 %v45_v10, %v38_v16 }
  0x85   :  { %v49_v18 = vsub.f32 %v31_v2, %v47_v17 }
  0x87   :  { %v51_v19 = vmul.f32 %v49_v18, %v49_v18 }
  0x89   :  { %v55_v20 = vsel %vm32_vm0, %v51_v19, 0.0 }
  0x8a   :  { %56 = vadd.xlane.f32.xlu1 %v55_v20 }
  0xf5   :  { %v54_v29 = vpop.xlane.xlu1 %53 }
  0xf6   :  { %v58_v30 = vmul.f32 %v54_v29, %v45_v10 }
  0xf8   :  { %v60_v31 = vadd.f32 1e-05, %v58_v30 }
  0xfa   :  { %157 = vrsqrt.f32 %v60_v31  ;;  %vm68_vm3 = vweird.f32 %v60_v31 }
  0xfd   :  { %v57_v32 = vpop.xlane.xlu1 %56 }
  0xfe   :  { %v59_v33 = vmul.f32 %v57_v32, %v45_v10 }
 0x100   :  { %v158_v34 = vpop.eup %157  ;;  %v61_v35 = vadd.f32 1e-05, %v59_v33 }
 0x101   :  { %v63_v36 = vmul.f32 %v158_v34, %v60_v31  ;;  %vm69_vm2 = vweird.f32 %v158_v34 }
 0x102   :  { %159 = vrsqrt.f32 %v61_v35  ;;  %vm70_vm4 = vmor %vm68_vm3, %vm69_vm2  ;;  %vm78_vm6 = vweird.f32 %v61_v35 }
 0x103   :  { %v64_v37 = vmul.f32 %v158_v34, %v63_v36 }
 0x105   :  { %v65_v38 = vmul.f32 0.5, %v64_v37 }
 0x107   :  { %v66_v39 = vsub.f32 1.5, %v65_v38 }
 0x108   :  { %v160_v40 = vpop.eup %159 }
 0x109   :  { %v67_v41 = vmul.f32 %v158_v34, %v66_v39  ;;  %v73_v42 = vmul.f32 %v160_v40, %v61_v35  ;;  %vm79_vm5 = vweird.f32 %v160_v40 }
 0x10a   :  { %vm80_vm7 = vmor %vm78_vm6, %vm79_vm5 }
 0x10b   :  { %v74_v44 = vmul.f32 %v160_v40, %v73_v42  ;;  %v71_v45 = vsel %vm70_vm4, %v158_v34, %v67_v41 }
 0x10c   :  { %v82_v46 = vmul.f32 %v71_v45, %v48_v13 }
 0x10d   :  { %v75_v47 = vmul.f32 0.5, %v74_v44 }
 0x10e   :  { %v88_v48 = vmul.f32 %v154_v43, %v82_v46 }
 0x10f   :  { %v76_v49 = vsub.f32 1.5, %v75_v47 }
 0x110   :  { %138 = vmatmul.msk.f32.vlgmr.msra.gmra.mxu0 %vm32_vm0, %v88_v48 }
 0x111   :  { %v77_v50 = vmul.f32 %v160_v40, %v76_v49 }
 0x113   :  { %v81_v51 = vsel %vm80_vm7, %v160_v40, %v77_v50 }
 0x114   :  { %v83_v52 = vmul.f32 %v81_v51, %v49_v18 }
 0x116   :  { %v89_v53 = vmul.f32 %v154_v43, %v83_v52 }
 0x118   :  { %139 = vmatmul.msk.f32.vlgmr.msra.gmra.mxu1 %vm32_vm0, %v89_v53 }
 0x18d   :  { %v121_v54 = vpop.f32.mrf.mxu0 }
 0x18e   :  { %v140_v55 = vclamps-f32 %v121_v54, 8.0 }
 0x190   :  { %131 = vst [vmem:[%s238_s3] sm:$0xff] %v140_v55 }
 0x195   :  { %v124_v56 = vpop.f32.mrf.mxu1 }
 0x196   :  { %v141_v57 = vclamps-f32 %v124_v56, 8.0 }
 0x198   :  { %132 = vst [vmem:[%s238_s3 + $0x8] sm:$0xff] %v141_v57 }
 0x199   :  { %137 = vsyncpa [#allocation3], 1 }

// kernel: dbrx_block_forward.7
= control target key start
LH: loop header
LB: loop body
LE: loop exit
PB: predicated region body
PF: predicated region fallthrough
CT: control target
= control target key end

     0   :  { %vm18_vm0 = vcmask 523264   ;;  %v93_v2 = vmov 0.0   ;;  %s164_s1 = inlined_call_operand.vmem [shape: f32[64,64], index: 1, kind: input, shape index: {}]   ;;  %s165_s0 = inlined_call_operand.vmem [shape: f32[16,64], index: 0, kind: input, shape index: {}]   ;;  %s166_s2 = inlined_call_operand.vmem [shape: f32[16,64], index: 2, kind: input, shape index: {}]   ;;  %s167_s3 = inlined_call_operand.vmem [shape: f32[16,64], index: 3, kind: output, shape index: {}]  }
   0x1   :  { %v32_v0 = vld [vmem:[%s164_s1 + $0x38] sm:$0xff]  ;;  %v31_v1 = vld [vmem:[%s164_s1 + $0x30] sm:$0xff]  ;;  %19 = vst.msk [vmem:[#allocation2] sm:$0xff] %vm18_vm0, %v93_v2  ;;  %v30_v3 = vld [vmem:[%s164_s1 + $0x28] sm:$0xff] }
   0x2   :  { %48 = vmatpush.msra.mxu0 %v32_v0  ;;  %84 = vmatpush.msra.mxu1 %v32_v0  ;;  %20 = vst.msk [vmem:[#allocation2 + $0x8] sm:$0xff] %vm18_vm0, %v93_v2  ;;  %v29_v4 = vld [vmem:[%s164_s1 + $0x20] sm:$0xff]  ;;  %v28_v5 = vld [vmem:[%s164_s1 + $0x18] sm:$0xff]  ;;  %v27_v6 = vld [vmem:[%s164_s1 + $0x10] sm:$0xff] }
   0x3   :  { %v26_v7 = vld [vmem:[%s164_s1 + $0x8] sm:$0xff]  ;;  %v25_v8 = vld [vmem:[%s164_s1] sm:$0xff] }
   0x4   :  { %49 = vmatpush.msra.mxu0 %v31_v1  ;;  %85 = vmatpush.msra.mxu1 %v31_v1  ;;  %v23_v9 = vld [vmem:[%s165_s0] sm:$0xff]  ;;  %v24_v10 = vld [vmem:[%s165_s0 + $0x8] sm:$0xff] }
   0x5   :  { %v72_v17 = vld [vmem:[%s166_s2] sm:$0xff]  ;;  %v73_v18 = vld [vmem:[%s166_s2 + $0x8] sm:$0xff] }
   0x6   :  { %50 = vmatpush.msra.mxu0 %v30_v3  ;;  %86 = vmatpush.msra.mxu1 %v30_v3 }
   0x8   :  { %51 = vmatpush.msra.mxu0 %v29_v4  ;;  %87 = vmatpush.msra.mxu1 %v29_v4  ;;  %v21_v11 = vld [vmem:[#allocation2] sm:$0xff] }
   0x9   :  { %v22_v12 = vld [vmem:[#allocation2 + $0x8] sm:$0xff] }
   0xa   :  { %52 = vmatpush.msra.mxu0 %v28_v5  ;;  %88 = vmatpush.msra.mxu1 %v28_v5 }
   0xc   :  { %53 = vmatpush.msra.mxu0 %v27_v6  ;;  %89 = vmatpush.msra.mxu1 %v27_v6 }
   0xe   :  { %54 = vmatpush.msra.mxu0 %v26_v7  ;;  %90 = vmatpush.msra.mxu1 %v26_v7 }
  0x10   :  { %55 = vmatpush.msra.mxu0 %v25_v8  ;;  %91 = vmatpush.msra.mxu1 %v25_v8 }
  0x11   :  { %82 = vmatmul.msk.f32.vlgmr.msra.gmra.mxu0 %vm18_vm0, %v23_v9  ;;  %83 = vmatmul.msk.f32.vlgmr.msra.gmra.mxu1 %vm18_vm0, %v24_v10 }
  0x8e   :  { %v57_v13 = vpop.f32.mrf.mxu0  ;;  %v60_v14 = vpop.f32.mrf.mxu1 }
  0x8f   :  { %v63_v15 = vadd.f32 %v57_v13, %v21_v11  ;;  %v64_v16 = vadd.f32 %v60_v14, %v22_v12 }
  0x91   :  { %65 = vst.msk [vmem:[#allocation2] sm:$0xff] %vm18_vm0, %v63_v15 }
  0x92   :  { %66 = vst.msk [vmem:[#allocation2 + $0x8] sm:$0xff] %vm18_vm0, %v64_v16 }
  0x98   :  { %v70_v19 = vld [vmem:[#allocation2] sm:$0xff] }
  0x99   :  { %v74_v20 = vadd.f32 %v72_v17, %v70_v19  ;;  %v71_v21 = vld [vmem:[#allocation2 + $0x8] sm:$0xff] }
  0x9a   :  { %v75_v22 = vadd.f32 %v73_v18, %v71_v21 }
  0x9b   :  { %76 = vst.msk [vmem:[%s167_s3] sm:$0xff] %vm18_vm0, %v74_v20 }
  0x9c   :  { %77 = vst.msk [vmem:[%s167_s3 + $0x8] sm:$0xff] %vm18_vm0, %v75_v22 }

// kernel: dbrx_block_forward.8
= control target key start
LH: loop header
LB: loop body
LE: loop exit
PB: predicated region body
PF: predicated region fallthrough
CT: control target
= control target key end

     0   :  { %vm18_vm0 = vcmask 523264   ;;  %v200_v4 = vmov 64.0   ;;  %vm115_vm8 = vcmask 31744   ;;  %s290_s0 = inlined_call_operand.vmem [shape: f32[16,64], index: 0, kind: input, shape index: {}]   ;;  %s291_s1 = inlined_call_operand.vmem [shape: f32[1,64], index: 1, kind: input, shape index: {}]   ;;  %s292_s2 = inlined_call_operand.vmem [shape: f32[64,4], index: 2, kind: input, shape index: {}]   ;;  %s293_s3 = inlined_call_operand.vmem [shape: f32[16,64], index: 3, kind: output, shape index: {0}]   ;;  %s294_s4 = inlined_call_operand.vmem [shape: f32[16,4], index: 4, kind: output, shape index: {1}]  }
   0x1   :  { %v16_v0 = vld [vmem:[%s290_s0] sm:$0xff]  ;;  %v17_v2 = vld [vmem:[%s290_s0 + $0x8] sm:$0xff]  ;;  %186 = vrcp.f32 %v200_v4  ;;  %v85_v21 = vld [vmem:[%s292_s2 + $0x38] sm:$0xff] }
   0x2   :  { %v19_v1 = vsel %vm18_vm0, %v16_v0, 0.0  ;;  %v22_v3 = vsel %vm18_vm0, %v17_v2, 0.0  ;;  %100 = vmatpush.msra.mxu0 %v85_v21  ;;  %176 = vmatpush.msra.mxu1 %v85_v21  ;;  %v84_v22 = vld [vmem:[%s292_s2 + $0x30] sm:$0xff]  ;;  %v83_v23 = vld [vmem:[%s292_s2 + $0x28] sm:$0xff]  ;;  %v82_v24 = vld [vmem:[%s292_s2 + $0x20] sm:$0xff] }
   0x3   :  { %20 = vadd.xlane.f32.xlu0 %v19_v1  ;;  %v81_v25 = vld [vmem:[%s292_s2 + $0x18] sm:$0xff]  ;;  %v80_v26 = vld [vmem:[%s292_s2 + $0x10] sm:$0xff]  ;;  %v79_v27 = vld [vmem:[%s292_s2 + $0x8] sm:$0xff] }
   0x4   :  { %101 = vmatpush.msra.mxu0 %v84_v22  ;;  %177 = vmatpush.msra.mxu1 %v84_v22  ;;  %v78_v28 = vld [vmem:[%s292_s2] sm:$0xff] }
   0x5   :  { %v185_v43 = vld [vmem:[%s291_s1] ss:$0 sm:$0xff] }
   0x6   :  { %102 = vmatpush.msra.mxu0 %v83_v23  ;;  %178 = vmatpush.msra.mxu1 %v83_v23 }
   0x7   :  { %v187_v5 = vpop.eup %186 }
   0x8   :  { %v26_v6 = vmul.f32 64.0, %v187_v5  ;;  %vm30_vm1 = vweird.f32 %v187_v5  ;;  %103 = vmatpush.msra.mxu0 %v82_v24  ;;  %179 = vmatpush.msra.mxu1 %v82_v24 }
   0xa   :  { %v27_v7 = vsub.f32 1.0, %v26_v6  ;;  %104 = vmatpush.msra.mxu0 %v81_v25  ;;  %180 = vmatpush.msra.mxu1 %v81_v25 }
   0xb   :  { %23 = vadd.xlane.f32.xlu0 %v22_v3 }
   0xc   :  { %v28_v8 = vmul.f32 %v187_v5, %v27_v7  ;;  %105 = vmatpush.msra.mxu0 %v80_v26  ;;  %181 = vmatpush.msra.mxu1 %v80_v26 }
   0xe   :  { %v29_v9 = vadd.f32 %v187_v5, %v28_v8  ;;  %106 = vmatpush.msra.mxu0 %v79_v27  ;;  %182 = vmatpush.msra.mxu1 %v79_v27 }
  0x10   :  { %v31_v10 = vsel %vm30_vm1, %v187_v5, %v29_v9  ;;  %107 = vmatpush.msra.mxu0 %v78_v28  ;;  %183 = vmatpush.msra.mxu1 %v78_v28 }
  0x76   :  { %v21_v11 = vpop.xlane.xlu0 %20 }
  0x77   :  { %v32_v12 = vmul.f32 %v31_v10, %v21_v11 }
  0x79   :  { %v34_v13 = vsub.f32 %v16_v0, %v32_v12 }
  0x7b   :  { %v36_v14 = vmul.f32 %v34_v13, %v34_v13 }
  0x7d   :  { %v38_v15 = vsel %vm18_vm0, %v36_v14, 0.0 }
  0x7e   :  { %39 = vadd.xlane.f32.xlu1 %v38_v15  ;;  %v24_v16 = vpop.xlane.xlu0 %23 }
  0x7f   :  { %v33_v17 = vmul.f32 %v31_v10, %v24_v16 }
  0x81   :  { %v235_v18 = vsub.f32 %v17_v2, %v33_v17 }
  0x83   :  { %v37_v19 = vmul.f32 %v235_v18, %v235_v18 }
  0x85   :  { %v41_v20 = vsel %vm18_vm0, %v37_v19, 0.0 }
  0x86   :  { %42 = vadd.xlane.f32.xlu1 %v41_v20 }
  0xf1   :  { %v40_v29 = vpop.xlane.xlu1 %39 }
  0xf2   :  { %v44_v30 = vmul.f32 %v40_v29, %v31_v10 }
  0xf4   :  { %v46_v31 = vadd.f32 1e-05, %v44_v30 }
  0xf6   :  { %188 = vrsqrt.f32 %v46_v31  ;;  %vm54_vm3 = vweird.f32 %v46_v31 }
  0xf9   :  { %v43_v32 = vpop.xlane.xlu1 %42 }
  0xfa   :  { %v45_v33 = vmul.f32 %v43_v32, %v31_v10 }
  0xfc   :  { %v189_v34 = vpop.eup %188  ;;  %v47_v35 = vadd.f32 1e-05, %v45_v33 }
  0xfd   :  { %v49_v36 = vmul.f32 %v189_v34, %v46_v31  ;;  %vm55_vm2 = vweird.f32 %v189_v34 }
  0xfe   :  { %190 = vrsqrt.f32 %v47_v35  ;;  %vm56_vm4 = vmor %vm54_vm3, %vm55_vm2  ;;  %vm64_vm6 = vweird.f32 %v47_v35 }
  0xff   :  { %v50_v37 = vmul.f32 %v189_v34, %v49_v36 }
 0x101   :  { %v51_v38 = vmul.f32 0.5, %v50_v37 }
 0x103   :  { %v52_v39 = vsub.f32 1.5, %v51_v38 }
 0x104   :  { %v191_v40 = vpop.eup %190 }
 0x105   :  { %v53_v41 = vmul.f32 %v189_v34, %v52_v39  ;;  %v59_v42 = vmul.f32 %v191_v40, %v47_v35  ;;  %vm65_vm5 = vweird.f32 %v191_v40 }
 0x106   :  { %vm66_vm7 = vmor %vm64_vm6, %vm65_vm5 }
 0x107   :  { %v60_v44 = vmul.f32 %v191_v40, %v59_v42  ;;  %v57_v45 = vsel %vm56_vm4, %v189_v34, %v53_v41 }
 0x108   :  { %v68_v46 = vmul.f32 %v57_v45, %v34_v13 }
 0x109   :  { %v61_v47 = vmul.f32 0.5, %v60_v44 }
 0x10a   :  { %v74_v48 = vmul.f32 %v185_v43, %v68_v46 }
 0x10b   :  { %v62_v49 = vsub.f32 1.5, %v61_v47 }
 0x10c   :  { %76 = vst.msk [vmem:[%s293_s3] sm:$0xff] %vm18_vm0, %v74_v48  ;;  %174 = vmatmul.msk.f32.vlgmr.msra.gmra.mxu0 %vm18_vm0, %v74_v48 }
 0x10d   :  { %v63_v50 = vmul.f32 %v191_v40, %v62_v49 }
 0x10f   :  { %v67_v51 = vsel %vm66_vm7, %v191_v40, %v63_v50 }
 0x110   :  { %v69_v52 = vmul.f32 %v67_v51, %v235_v18 }
 0x112   :  { %v75_v53 = vmul.f32 %v185_v43, %v69_v52 }
 0x114   :  { %77 = vst.msk [vmem:[%s293_s3 + $0x8] sm:$0xff] %vm18_vm0, %v75_v53  ;;  %175 = vmatmul.msk.f32.vlgmr.msra.gmra.mxu1 %vm18_vm0, %v75_v53 }
 0x189   :  { %v109_v54 = vpop.f32.mrf.mxu0 }
 0x18a   :  { %v116_v55 = vsel %vm115_vm8, %v109_v54, -inf }
 0x18b   :  { %117 = vmax.xlane.f32.xlu2 %v116_v55 }
 0x191   :  { %v112_v56 = vpop.f32.mrf.mxu1 }
 0x192   :  { %v119_v57 = vsel %vm115_vm8, %v112_v56, -inf }
 0x193   :  { %120 = vmax.xlane.f32.xlu2 %v119_v57 }
 0x1fe   :  { %v118_v58 = vpop.xlane.xlu2 %117 }
 0x1ff   :  { %v122_v59 = vsub.f32 %v109_v54, %v118_v58 }
 0x201   :  { %v124_v60 = vmul.f32 1.442695, %v122_v59 }
 0x203   :  { %192 = vpow2.f32 %v124_v60 }
 0x206   :  { %v121_v61 = vpop.xlane.xlu2 %120 }
 0x207   :  { %v123_v62 = vsub.f32 %v112_v56, %v121_v61 }
 0x209   :  { %v193_v63 = vpop.eup %192  ;;  %v126_v0 = vmul.f32 1.442695, %v123_v62 }
 0x20a   :  { %v128_v1 = vsel %vm115_vm8, %v193_v63, 0.0 }
 0x20b   :  { %194 = vpow2.f32 %v126_v0  ;;  %129 = vadd.xlane.f32.xlu0 %v128_v1 }
 0x211   :  { %v195_v2 = vpop.eup %194 }
 0x212   :  { %v131_v3 = vsel %vm115_vm8, %v195_v2, 0.0 }
 0x213   :  { %132 = vadd.xlane.f32.xlu1 %v131_v3 }
 0x27e   :  { %v130_v4 = vpop.xlane.xlu0 %129 }
 0x27f   :  { %196 = vrcp.f32 %v130_v4  ;;  %v145_v9 = vand.u32 2147483648, %v130_v4  ;;  %v143_v11 = vand.u32 2147483647, %v130_v4  ;;  %vm139_vm10 = vweird.f32 %v130_v4 }
 0x281   :  { %v146_v14 = vor.u32 1.1754944e-38, %v145_v9  ;;  %vm144_vm12 = vcmp.eq.f32.partialorder %v143_v11, 8.507059e+37 }
 0x285   :  { %v197_v5 = vpop.eup %196 }
 0x286   :  { %v135_v6 = vmul.f32 %v197_v5, %v130_v4  ;;  %v133_v7 = vpop.xlane.xlu1 %132  ;;  %vm140_vm9 = vweird.f32 %v197_v5 }
 0x287   :  { %198 = vrcp.f32 %v133_v7  ;;  %vm141_vm11 = vmor %vm139_vm10, %vm140_vm9  ;;  %v160_v20 = vand.u32 2147483648, %v133_v7  ;;  %v158_v22 = vand.u32 2147483647, %v133_v7  ;;  %vm154_vm14 = vweird.f32 %v133_v7 }
 0x288   :  { %v136_v8 = vsub.f32 1.0, %v135_v6 }
 0x289   :  { %v161_v24 = vor.u32 1.1754944e-38, %v160_v20  ;;  %vm159_vm0 = vcmp.eq.f32.partialorder %v158_v22, 8.507059e+37 }
 0x28a   :  { %v137_v10 = vmul.f32 %v197_v5, %v136_v8 }
 0x28c   :  { %v138_v12 = vadd.f32 %v197_v5, %v137_v10 }
 0x28d   :  { %v199_v13 = vpop.eup %198 }
 0x28e   :  { %v142_v15 = vsel %vm141_vm11, %v197_v5, %v138_v12  ;;  %v150_v16 = vmul.f32 %v199_v13, %v133_v7  ;;  %vm155_vm13 = vweird.f32 %v199_v13 }
 0x28f   :  { %v147_v17 = vsel %vm144_vm12, %v146_v14, %v142_v15  ;;  %vm156_vm15 = vmor %vm154_vm14, %vm155_vm13 }
 0x290   :  { %v148_v18 = vmul.f32 %v193_v63, %v147_v17  ;;  %v151_v19 = vsub.f32 1.0, %v150_v16 }
 0x292   :  { %164 = vst.msk [vmem:[%s294_s4] sm:$0xff] %vm115_vm8, %v148_v18  ;;  %v152_v21 = vmul.f32 %v199_v13, %v151_v19 }
 0x294   :  { %v153_v23 = vadd.f32 %v199_v13, %v152_v21 }
 0x296   :  { %v157_v25 = vsel %vm156_vm15, %v199_v13, %v153_v23 }
 0x297   :  { %v162_v26 = vsel %vm159_vm0, %v161_v24, %v157_v25 }
 0x298   :  { %v163_v27 = vmul.f32 %v195_v2, %v162_v26 }
 0x29a   :  { %165 = vst.msk [vmem:[%s294_s4 + $0x8] sm:$0xff] %vm115_vm8, %v163_v27 }

// kernel: dbrx_block_forward.6
= control target key start
LH: loop header
LB: loop body
LE: loop exit
PB: predicated region body
PF: predicated region fallthrough
CT: control target
= control target key end

     0   :  { %12 = vsyncpa [#allocation3], 0  ;;  %s1450_s0 = inlined_call_operand.vmem [shape: f32[2,4,8,16], index: 0, kind: input, shape index: {}]   ;;  %s1451_s1 = inlined_call_operand.vmem [shape: f32[2,2,8,16], index: 1, kind: input, shape index: {}]   ;;  %s1452_s2 = inlined_call_operand.vmem [shape: f32[2,2,8,16], index: 2, kind: input, shape index: {}]   ;;  %s1453_s3 = inlined_call_operand.vmem [shape: f32[2,8,16], index: 3, kind: input, shape index: {}]   ;;  %s1454_s4 = inlined_call_operand.vmem [shape: f32[2,8,16], index: 4, kind: input, shape index: {}]   ;;  %s1455_s5 = inlined_call_operand.vmem [shape: f32[2,4,8,16], index: 5, kind: output, shape index: {0}]   ;;  %s1456_s6 = inlined_call_operand.hbm [shape: f32[2,2,8,16], index: 6, kind: output, shape index: {1}]  }
   0x1   :  { %14 = vsyncpa [#allocation3 + $0x1], 0  ;;  %s1211_s21 = smov 0   ;;  %s1213_s22 = smov 0  }
   0x2   :  { %s1215_s23 = smov 0   ;;  %s1217_s24 = smov 0  }
   0x3 LB: > { %s1232_s25 = sadd.s32 4294967295, %s1170_s24   ;;  %s991_s26 = sadd.s32 4294967294, %s1170_s24   ;;  %s1170_s24 = sphi %s1217_s24, %s1464_s24   ;;  %s1166_s23 = sphi %s1215_s23, %s1463_s23   ;;  %s1162_s22 = sphi %s1213_s22, %s1462_s22   ;;  %s1158_s21 = sphi %s1211_s21, %s1461_s21  }
   0x4   : > { %s1236_s27 = sadd.s32 1, %s1170_s24   ;;  %s183_s28 = sadd.s32 1, %s1166_s23 }
   0x5   : > { %s180_s29 = ssub.s32 %s1170_s24, %s1236_s27  ;;  %p193_p0 = scmp.ne.s32.totalorder %s1166_s23, %s1162_s22 }
   0x6   : > { %p181_p1 = scmp.eq.s32.totalorder %s180_s29, 0  ;;  %p194_p2 = scmp.eq.s32.totalorder %s1232_s25, 1 }
   0x7   : > { %p199_p3 = scmp.ne.s32.totalorder %s1162_s22, %s1158_s21  ;;  %p200_p4 = scmp.eq.s32.totalorder %s991_s26, 1 }
   0x8   : > { %s1247_s30 = scalar_select %p181_p1, %s1166_s23, %s183_s28  }
   0x9   : > { %p1249_p5 = por %p194_p2, %p193_p0  ;;  %p1253_p6 = por %p200_p4, %p199_p3 }
   0xa   : > { %p994_p7 = scmp.ge.s32.totalorder %s1170_s24, 1  ;;  %p256_p8 = scmp.lt.s32.totalorder %s1170_s24, 3 }
   0xc   : > { %p257_p9 = pnand %p994_p7, %p256_p8 }
   0xd   : > { %p309_p10 = scmp.lt.s32.totalorder (!%p257_p9), %s1232_s25, 1  ;;  %s306_s13 = sand.u32 (!%p257_p9), 1, %s1162_s22  }
   0xe   : > { %260 = sbr.rel (%p257_p9) target bundleno = 1241 (0x4d9), region = 40  ;;  %s995_s15 = sshll.u32 (!%p257_p9), %s306_s13, 4 }
   0xf   : > { %s1332_s16 = scalar_lea.vmem (!%p257_p9), [#allocation2], %s995_s15  ;;  %s838_s15 = scalar_lea.sflag (!%p257_p9), [#allocation3], %s306_s13 }
  0x13   : > { %v339_v0 = vlaneseq  ;;  %s1265_s9 = scalar_select %p309_p10, %s1232_s25, 1  ;;  %v1172_v6 = vmov 0.0   ;;  %vm359_vm3 = vcmask 130048   ;;  %v1173_v13 = vmov 1.0  }
  0x14   : > { %vm474_vm5 = vcmask 64512  }
  0x15   : > { %v1260_v1 = vshrl.u32 %v339_v0, 7  ;;  %v1262_v2 = vand.u32 127, %v339_v0  ;;  %s1044_s10 = sshll.u32 %s1265_s9, 5  ;;  %s1045_s11 = sshll.u32 %s1265_s9, 4 }
  0x16   : > { %s1277_s14 = scalar_lea.vmem %s1450_s0, %s1044_s10  ;;  %s318_s17 = scalar_lea.vmem %s1451_s1, %s1045_s11 }
  0x17   : > { %v341_v3 = vadd.s32 8, %v1260_v1  ;;  %v344_v4 = vadd.s32 8, %v1262_v2  ;;  %v419_v11 = vld [vmem:[%s1277_s14] sm:$0xff]  ;;  %v1008_v14 = vld [vmem:[%s318_s17 + $0x8] sm:$0xff]  ;;  %s1002_s18 = sshll.u32 %s1265_s9, 3  ;;  %vm356_vm4 = vcmp.ge.s32.totalorder %v1260_v1, %v1262_v2  ;;  %s323_s19 = scalar_lea.vmem %s1452_s2, %s1045_s11 }
  0x18   : > { %v357_v12 = vld [vmem:[%s318_s17] sm:$0xff]  ;;  %v1018_v15 = vld [vmem:[%s1277_s14 + $0x8] sm:$0xff]  ;;  %s327_s26 = scalar_lea.vmem %s1453_s3, %s1002_s18  ;;  %s331_s12 = scalar_lea.vmem %s1454_s4, %s1002_s18 }
  0x19   : > { %vm346_vm0 = vcmp.eq.s32.totalorder %v341_v3, %v344_v4  ;;  %v349_v5 = vadd.s32 8, %v341_v3  ;;  %vm1287_vm2 = vcmp.eq.s32.totalorder %v1262_v2, %v341_v3  ;;  %v1320_v16 = vld [vmem:[%s327_s26] sm:$0xff]  ;;  %v1011_v53 = vld [vmem:[%s323_s19 + $0x8] sm:$0xff]  ;;  %s1388_s26 = scalar_lea.vmem %s1455_s5, %s1044_s10  ;;  %s853_s9 = sshll.u32 %s1332_s16, 4  ;;  %s854_s9 = int_to_ptr.vmem [resolvable:$true] %s853_s9 }
  0x1a   : > { %v348_v7 = vsel %vm346_vm0, -1.0, %v1172_v6  ;;  %v1323_v17 = vld [vmem:[%s331_s12] sm:$0xff]  ;;  %v358_v18 = vmul.f32 %v357_v12, %v1320_v16  ;;  %v389_v20 = vmul.f32 %v1008_v14, %v1320_v16  ;;  %v420_v25 = vmul.f32 %v419_v11, %v1320_v16  ;;  %s1048_s10 = sshll.u32 %s1232_s25, 4 }
  0x1b   : > { %vm351_vm1 = vcmp.eq.s32.totalorder %v1262_v2, %v349_v5  ;;  %v525_v30 = vmul.f32 %v1018_v15, %v1320_v16  ;;  %v385_v52 = vld [vmem:[%s323_s19] sm:$0xff]  ;;  %s852_s29 = scalar_lea.hbm %s1456_s6, %s1048_s10  ;;  %s1128_s19 = scalar_lea.hbm %s1456_s6, 32 }
  0x1c   : > { %v353_v8 = vsel %vm351_vm1, 1.0, %v1172_v6  ;;  %s855_s12 = sshll.u32 %s852_s29, 4  ;;  %s856_s12 = int_to_ptr.hbm [resolvable:$true] %s855_s12 }
  0x1d   : > { %v1284_v9 = vadd.f32 %v353_v8, %v348_v7 }
  0x1f   : > { %438 = vmatpush.msra.mxu2 %v1284_v9  ;;  %377 = vmatpush.msra.mxu0 %v1284_v9 }
  0x20   : > { %407 = vmatpush.msra.mxu1 %v1284_v9 }
  0x21   : > { %1013 = vmatpush.msk.msra.mxu2 %vm1287_vm2, %v1173_v13  ;;  %1006 = vmatpush.msk.msra.mxu0 %vm1287_vm2, %v1173_v13 }
  0x22   : > { %1014 = vmatmul.msk.f32.vlgmr.msra.gmra.mxu2 %vm359_vm3, %v419_v11  ;;  %1007 = vmatmul.msk.f32.vlgmr.msra.gmra.mxu0 %vm359_vm3, %v357_v12 }
  0x23   : > { %1009 = vmatpush.msk.msra.mxu1 %vm1287_vm2, %v1173_v13  ;;  %517 = vmatpush.msrb.mxu0 %v385_v52 }
  0x24   : > { %1010 = vmatmul.msk.f32.vlgmr.msra.gmra.mxu1 %vm359_vm3, %v1008_v14 }
  0x25   : > { %543 = vmatpush.msrb.mxu1 %v1284_v9  ;;  %645 = vmatpush.msra.mxu0 %v1284_v9 }
  0x27   : > { %1019 = vmatpush.msk.msrb.mxu1 %vm1287_vm2, %v1173_v13  ;;  %1026 = vmatpush.msk.msra.mxu0 %vm1287_vm2, %v1173_v13 }
  0x2c   : > { %1020 = vmatmul.msk.f32.vlgmr.msrb.gmra.mxu1 %vm359_vm3, %v1018_v15  ;;  %v1025_v15 = vld [vmem:[%s1277_s14 + $0x10] sm:$0xff] }
  0x9f   : > { %v380_v19 = vpop.f32.mrf.mxu0 }
  0xa0   : > { %v383_v21 = vmul.f32 %v380_v19, %v1323_v17  ;;  %v1032_v19 = vld [vmem:[%s1277_s14 + $0x18] sm:$0xff] }
  0xa1   : > { %v410_v22 = vpop.f32.mrf.mxu1 }
  0xa2   : > { %v384_v23 = vadd.f32 %v383_v21, %v358_v18  ;;  %v413_v24 = vmul.f32 %v410_v22, %v1323_v17  ;;  %v627_v21 = vmul.f32 %v1025_v15, %v1320_v16 }
  0xa4   : > { %386 = vst.msk [vmem:[%s1332_s16] sm:$0xff] %vm359_vm3, %v384_v23  ;;  %v1336_v26 = vadd.f32 %v413_v24, %v389_v20  ;;  %1015 = vmatpush.xpose.msk.msra.mxu3 %vm359_vm3, %v384_v23  ;;  %1021 = vmatpush.xpose.msk.msrb.mxu2 %vm359_vm3, %v384_v23 }
  0xa5   : > { %v441_v27 = vpop.f32.mrf.mxu2 }
  0xa6   : > { %1012 = vst.msk [vmem:[%s1332_s16 + $0x8] sm:$0xff] %vm359_vm3, %v1336_v26  ;;  %v444_v28 = vmul.f32 %v441_v27, %v1323_v17  ;;  %1028 = vmatpush.xpose.msk.msra.mxu1 %vm359_vm3, %v1336_v26  ;;  %s1122_s16 = sshra.s32 %s856_s12, 4  ;;  %s1123_s16 = int_to_ptr.hbm [resolvable:$true] %s1122_s16 }
  0xa7   : > { %s1124_s17 = scalar_lea.hbm %s1123_s16, 16  ;;  %p1129_p0 = scmp.lt.s32.totalorder %s1123_s16, %s1456_s6 }
  0xa8   : > { %v445_v29 = vadd.f32 %v444_v28, %v420_v25  ;;  %618 = vmatpush.msrb.mxu3 %v385_v52  ;;  %723 = vmatpush.msra.mxu2 %v1011_v53  ;;  %p1125_p11 = scmp.ne.s32.totalorder %s1123_s16, %s1124_s17  ;;  %p1130_p1 = scmp.lt.s32.totalorder %s1128_s19, %s1124_s17 }
  0xa9   : > { %v546_v31 = vpop.f32.mrf.mxu1 }
  0xaa   : > { %1016 = vmatmul.msk.f32.vlgmr.msra.gmra.mxu3 %vm359_vm3, %v445_v29  ;;  %v549_v32 = vmul.f32 %v546_v31, %v1323_v17  ;;  %825 = vmatpush.msrb.mxu1 %v1011_v53  ;;  %p1126_p12 = pnand %p1125_p11, %p1249_p5  ;;  %p1131_p2 = por %p1130_p1, %p1129_p0 }
  0xab   : > { %750 = vmatpush.msra.mxu3 %v1284_v9 }
  0xac   : > { %v550_v33 = vadd.f32 %v549_v32, %v525_v30  ;;  %p1127_p13 = pneg %p1126_p12 }
  0xad   : > { %1033 = vmatpush.msk.msra.mxu3 %vm1287_vm2, %v1173_v13 }
  0xae   : > { %1022 = vmatmul.msk.f32.vlgmr.msrb.gmra.mxu2 %vm359_vm3, %v550_v33  ;;  %p1132_p3 = pnand %p1131_p2, %p1127_p13 }
 0x12d   : > { %v469_v34 = vpop.f32.mrf.mxu3 }
 0x12e   : > { %v472_v35 = vmul.f32 0.25, %v469_v34 }
 0x130   : > { %v473_v36 = vsel %vm356_vm4, %v472_v35, -1e+30 }
 0x131   : > { %v475_v37 = vsel %vm474_vm5, %v473_v36, -inf  ;;  %v571_v38 = vpop.f32.mrf.mxu2 }
 0x132   : > { %476 = vmax.xlane.f32.xlu0 %v475_v37  ;;  %v574_v39 = vmul.f32 0.25, %v571_v38 }
 0x134   : > { %v575_v40 = vsel %vm356_vm4, %v574_v39, -1e+30 }
 0x135   : > { %v576_v41 = vsel %vm474_vm5, %v575_v40, -inf }
 0x13a   : > { %577 = vmax.xlane.f32.xlu0 %v576_v41 }
 0x1a5   : > { %v477_v42 = vpop.xlane.xlu0 %476 }
 0x1a6   : > { %v478_v43 = vsub.f32 %v473_v36, %v477_v42 }
 0x1a8   : > { %v479_v44 = vmul.f32 1.442695, %v478_v43 }
 0x1aa   : > { %1092 = vpow2.f32 %v479_v44 }
 0x1ad   : > { %v578_v45 = vpop.xlane.xlu0 %577 }
 0x1ae   : > { %v579_v46 = vsub.f32 %v575_v40, %v578_v45 }
 0x1b0   : > { %v1093_v47 = vpop.eup %1092  ;;  %v580_v48 = vmul.f32 1.442695, %v579_v46 }
 0x1b1   : > { %v481_v49 = vsel %vm474_vm5, %v1093_v47, 0.0 }
 0x1b2   : > { %1094 = vpow2.f32 %v580_v48  ;;  %482 = vadd.xlane.f32.xlu1 %v481_v49 }
 0x1b8   : > { %v1095_v50 = vpop.eup %1094 }
 0x1b9   : > { %v582_v51 = vsel %vm474_vm5, %v1095_v50, 0.0 }
 0x1ba   : > { %583 = vadd.xlane.f32.xlu1 %v582_v51 }
 0x225   : > { %v483_v54 = vpop.xlane.xlu1 %482 }
 0x226   : > { %1096 = vrcp.f32 %v483_v54  ;;  %v495_v59 = vand.u32 2147483648, %v483_v54  ;;  %v493_v61 = vand.u32 2147483647, %v483_v54  ;;  %vm489_vm7 = vweird.f32 %v483_v54 }
 0x228   : > { %v496_v0 = vor.u32 1.1754944e-38, %v495_v59  ;;  %vm494_vm9 = vcmp.eq.f32.partialorder %v493_v61, 8.507059e+37 }
 0x22c   : > { %v1097_v55 = vpop.eup %1096 }
 0x22d   : > { %v485_v56 = vmul.f32 %v1097_v55, %v483_v54  ;;  %v584_v57 = vpop.xlane.xlu1 %583  ;;  %vm490_vm6 = vweird.f32 %v1097_v55 }
 0x22e   : > { %1098 = vrcp.f32 %v584_v57  ;;  %vm491_vm8 = vmor %vm489_vm7, %vm490_vm6  ;;  %v596_v8 = vand.u32 2147483648, %v584_v57  ;;  %v594_v10 = vand.u32 2147483647, %v584_v57  ;;  %vm590_vm11 = vweird.f32 %v584_v57 }
 0x22f   : > { %v486_v58 = vsub.f32 1.0, %v485_v56 }
 0x230   : > { %v597_v12 = vor.u32 1.1754944e-38, %v596_v8  ;;  %vm595_vm13 = vcmp.eq.f32.partialorder %v594_v10, 8.507059e+37 }
 0x231   : > { %v487_v60 = vmul.f32 %v1097_v55, %v486_v58 }
 0x233   : > { %v488_v62 = vadd.f32 %v1097_v55, %v487_v60 }
 0x234   : > { %v1099_v63 = vpop.eup %1098 }
 0x235   : > { %v586_v3 = vmul.f32 %v1099_v63, %v584_v57  ;;  %v492_v4 = vsel %vm491_vm8, %v1097_v55, %v488_v62  ;;  %vm591_vm10 = vweird.f32 %v1099_v63 }
 0x236   : > { %v497_v5 = vsel %vm494_vm9, %v496_v0, %v492_v4  ;;  %vm592_vm12 = vmor %vm590_vm11, %vm591_vm10 }
 0x237   : > { %v587_v6 = vsub.f32 1.0, %v586_v3  ;;  %v498_v7 = vmul.f32 %v1093_v47, %v497_v5 }
 0x239   : > { %v588_v9 = vmul.f32 %v1099_v63, %v587_v6  ;;  %1017 = vmatmul.msk.f32.vlgmr.msrb.gmra.mxu0 %vm474_vm5, %v498_v7 }
 0x23a   : > { %1035 = vmatpush.xpose.msk.msrb.mxu0 %vm359_vm3, %v1336_v26  ;;  %v732_v26 = vmul.f32 %v1032_v19, %v1320_v16 }
 0x23b   : > { %v589_v11 = vadd.f32 %v1099_v63, %v588_v9 }
 0x23d   : > { %v593_v13 = vsel %vm592_vm12, %v1099_v63, %v589_v11 }
 0x23e   : > { %v598_v14 = vsel %vm595_vm13, %v597_v12, %v593_v13 }
 0x23f   : > { %v599_v18 = vmul.f32 %v1095_v50, %v598_v14 }
 0x241   : > { %1023 = vmatmul.msk.f32.vlgmr.msrb.gmra.mxu3 %vm474_vm5, %v599_v18  ;;  %1027 = vmatmul.msk.f32.vlgmr.msra.gmra.mxu0 %vm359_vm3, %v1025_v15 }
 0x249   : > { %1034 = vmatmul.msk.f32.vlgmr.msra.gmra.mxu3 %vm359_vm3, %v1032_v19 }
 0x2b6   : > { %v519_v20 = vpop.f32.mrf.mxu0 }
 0x2b7   : > { %522 = vst.msk [vmem:[%s1388_s26] sm:$0xff] %vm359_vm3, %v519_v20 }
 0x2be   : > { %v648_v22 = vpop.f32.mrf.mxu0 }
 0x2bf   : > { %v651_v23 = vmul.f32 %v648_v22, %v1323_v17 }
 0x2c1   : > { %v652_v24 = vadd.f32 %v651_v23, %v627_v21 }
 0x2c3   : > { %1029 = vmatmul.msk.f32.vlgmr.msra.gmra.mxu1 %vm359_vm3, %v652_v24 }
 0x2c4   : > { %v620_v25 = vpop.f32.mrf.mxu3 }
 0x2c5   : > { %1024 = vst.msk [vmem:[%s1388_s26 + $0x8] sm:$0xff] %vm359_vm3, %v620_v25 }
 0x2cc   : > { %v753_v27 = vpop.f32.mrf.mxu3 }
 0x2cd   : > { %v756_v28 = vmul.f32 %v753_v27, %v1323_v17 }
 0x2cf   : > { %v757_v29 = vadd.f32 %v756_v28, %v732_v26 }
 0x2d1   : > { %1036 = vmatmul.msk.f32.vlgmr.msrb.gmra.mxu0 %vm359_vm3, %v757_v29 }
 0x340   : > { %v676_v30 = vpop.f32.mrf.mxu1 }
 0x341   : > { %v679_v31 = vmul.f32 0.25, %v676_v30 }
 0x343   : > { %v680_v32 = vsel %vm356_vm4, %v679_v31, -1e+30 }
 0x344   : > { %v681_v33 = vsel %vm474_vm5, %v680_v32, -inf }
 0x345   : > { %682 = vmax.xlane.f32.xlu2 %v681_v33 }
 0x34e   : > { %v778_v34 = vpop.f32.mrf.mxu0 }
 0x34f   : > { %v781_v35 = vmul.f32 0.25, %v778_v34 }
 0x351   : > { %v782_v16 = vsel %vm356_vm4, %v781_v35, -1e+30 }
 0x352   : > { %v783_v17 = vsel %vm474_vm5, %v782_v16, -inf }
 0x353   : > { %784 = vmax.xlane.f32.xlu2 %v783_v17 }
 0x3b8   : > { %v683_v36 = vpop.xlane.xlu2 %682 }
 0x3b9   : > { %v684_v37 = vsub.f32 %v680_v32, %v683_v36 }
 0x3bb   : > { %v685_v38 = vmul.f32 1.442695, %v684_v37 }
 0x3bd   : > { %1100 = vpow2.f32 %v685_v38 }
 0x3c3   : > { %v1101_v39 = vpop.eup %1100 }
 0x3c4   : > { %v687_v40 = vsel %vm474_vm5, %v1101_v39, 0.0 }
 0x3c5   : > { %688 = vadd.xlane.f32.xlu0 %v687_v40 }
 0x3c6   : > { %v785_v41 = vpop.xlane.xlu2 %784 }
 0x3c7   : > { %v786_v42 = vsub.f32 %v782_v16, %v785_v41 }
 0x3c9   : > { %v787_v43 = vmul.f32 1.442695, %v786_v42 }
 0x3cb   : > { %1102 = vpow2.f32 %v787_v43 }
 0x3d1   : > { %v1103_v44 = vpop.eup %1102 }
 0x3d2   : > { %v789_v45 = vsel %vm474_vm5, %v1103_v44, 0.0 }
 0x3d3   : > { %790 = vadd.xlane.f32.xlu1 %v789_v45 }
 0x438   : > { %v689_v1 = vpop.xlane.xlu0 %688 }
 0x439   : > { %1104 = vrcp.f32 %v689_v1  ;;  %v701_v48 = vand.u32 2147483648, %v689_v1  ;;  %v699_v50 = vand.u32 2147483647, %v689_v1  ;;  %vm695_vm15 = vweird.f32 %v689_v1 }
 0x43b   : > { %v702_v53 = vor.u32 1.1754944e-38, %v701_v48  ;;  %vm700_vm1 = vcmp.eq.f32.partialorder %v699_v50, 8.507059e+37 }
 0x43f   : > { %v1105_v2 = vpop.eup %1104 }
 0x440   : > { %v691_v46 = vmul.f32 %v1105_v2, %v689_v1  ;;  %vm696_vm14 = vweird.f32 %v1105_v2 }
 0x441   : > { %vm697_vm0 = vmor %vm695_vm15, %vm696_vm14 }
 0x442   : > { %v692_v47 = vsub.f32 1.0, %v691_v46 }
 0x444   : > { %v693_v49 = vmul.f32 %v1105_v2, %v692_v47 }
 0x446   : > { %v694_v51 = vadd.f32 %v1105_v2, %v693_v49  ;;  %v791_v52 = vpop.xlane.xlu1 %790 }
 0x447   : > { %1106 = vrcp.f32 %v791_v52  ;;  %v803_v60 = vand.u32 2147483648, %v791_v52  ;;  %v801_v62 = vand.u32 2147483647, %v791_v52  ;;  %vm797_vm4 = vweird.f32 %v791_v52 }
 0x448   : > { %v698_v54 = vsel %vm697_vm0, %v1105_v2, %v694_v51 }
 0x449   : > { %v703_v55 = vsel %vm700_vm1, %v702_v53, %v698_v54  ;;  %v804_v0 = vor.u32 1.1754944e-38, %v803_v60  ;;  %vm802_vm7 = vcmp.eq.f32.partialorder %v801_v62, 8.507059e+37 }
 0x44a   : > { %v704_v56 = vmul.f32 %v1101_v39, %v703_v55 }
 0x44c   : > { %1030 = vmatmul.msk.f32.vlgmr.msra.gmra.mxu2 %vm474_vm5, %v704_v56 }
 0x44d   : > { %v1107_v57 = vpop.eup %1106 }
 0x44e   : > { %v793_v58 = vmul.f32 %v1107_v57, %v791_v52  ;;  %vm798_vm2 = vweird.f32 %v1107_v57 }
 0x44f   : > { %vm799_vm6 = vmor %vm797_vm4, %vm798_vm2 }
 0x450   : > { %v794_v59 = vsub.f32 1.0, %v793_v58 }
 0x452   : > { %v795_v61 = vmul.f32 %v1107_v57, %v794_v59 }
 0x454   : > { %v796_v63 = vadd.f32 %v1107_v57, %v795_v61 }
 0x456   : > { %v800_v3 = vsel %vm799_vm6, %v1107_v57, %v796_v63 }
 0x457   : > { %v805_v4 = vsel %vm802_vm7, %v804_v0, %v800_v3 }
 0x458   : > { %v806_v5 = vmul.f32 %v1103_v44, %v805_v4 }
 0x45a   : > { %1037 = vmatmul.msk.f32.vlgmr.msrb.gmra.mxu1 %vm474_vm5, %v806_v5 }
 0x45b   : > { %1135 = shalt.err (!%p1132_p3)
}
 0x45c   : > { %s1174_s13 = smov 128   ;;  %s1175_s10 = smov 8  }
 0x45d   : > { %1049 = dma.vmem_to_hbm [thread:$0]  (%p1249_p5), %s854_s9, 256, %s856_s12, %s838_s15, %s1174_s13, %s1174_s13, %s1175_s10  }
 0x4cf   : > { %v725_v6 = vpop.f32.mrf.mxu2 }
 0x4d0   : > { %1031 = vst.msk [vmem:[%s1388_s26 + $0x10] sm:$0xff] %vm359_vm3, %v725_v6 }
 0x4d7   : > { %v827_v7 = vpop.f32.mrf.mxu1 }
 0x4d8   : > { %1038 = vst.msk [vmem:[%s1388_s26 + $0x18] sm:$0xff] %vm359_vm3, %v827_v7 }
 0x4d9 PF: > { %p1055_p4 = scmp.ge.s32.totalorder %s1170_s24, 2  ;;  %s878_s14 = sand.u32 1, %s1158_s21  }
 0x4da   : > { %s879_s28 = scalar_lea.sflag [#allocation3], %s878_s14 }
 0x4db   : > { %p1052_p7 = pnand %p1055_p4, %p1253_p6 }
 0x4dd   : > { %p1053_p8 = pneg %p1052_p7 }
 0x4df   : > { %1153 = dma.done.wait (%p1053_p8), %s879_s28, 256  }
 0x4e0   : > { %1155 = vsyncadd (%p1053_p8), %s879_s28, 4294967040  ;;  %p17_p5 = scmp.ge.s32.totalorder %s1236_s27, 4   ;;  %s1461_s21 = smov %s1162_s22 }
 0x4e1   : > { %s1462_s22 = smov %s1166_s23  ;;  %s1463_s23 = smov %s1247_s30 }
 0x4e2   : > { %s1464_s24 = smov %s1236_s27  ;;  %19 = sbr.rel (!%p17_p5) target bundleno = 3 (0x3), region = 108 }
 0x4e7   :  { %885 = vsyncpa [#allocation3], 1 }
 0x4e8   :  { %887 = vsyncpa [#allocation3 + $0x1], 1 }

// kernel: dbrx_block_forward.9
= control target key start
LH: loop header
LB: loop body
LE: loop exit
PB: predicated region body
PF: predicated region fallthrough
CT: control target
= control target key end

     0   :  { %11 = vsyncpa [#allocation4], 0  ;;  %s889_s21 = smov 0   ;;  %s891_s22 = smov 0   ;;  %s1002_s0 = inlined_call_operand.vmem [shape: f32[16,64], index: 0, kind: input, shape index: {}]   ;;  %s1003_s1 = inlined_call_operand.vmem [shape: f32[16,64], index: 1, kind: input, shape index: {}]   ;;  %s1004_s2 = inlined_call_operand.vmem [shape: f32[4,64,128], index: 2, kind: input, shape index: {}]   ;;  %s1005_s3 = inlined_call_operand.vmem [shape: f32[4,64,128], index: 3, kind: input, shape index: {}]   ;;  %s1006_s4 = inlined_call_operand.vmem [shape: f32[4,128,64], index: 4, kind: input, shape index: {}]   ;;  %s1007_s5 = inlined_call_operand.vmem [shape: f32[4,16,1], index: 5, kind: input, shape index: {}]   ;;  %s1008_s6 = inlined_call_operand.hbm [shape: f32[16,64], index: 6, kind: output, shape index: {}]  }
   0x1   :  { %s893_s23 = smov 0  }
   0x2 LB: > { %s703_s24 = sadd.s32 4294967295, %s847_s23   ;;  %s26_s25 = sadd.s32 1, %s843_s22  ;;  %s847_s23 = sphi %s893_s23, %s17_s23   ;;  %s843_s22 = sphi %s891_s22, %s1010_s22   ;;  %s839_s21 = sphi %s889_s21, %s1009_s21  }
   0x3   : > { %p27_p0 = scmp.ge.s32.totalorder %s26_s25, 4  ;;  %p708_p1 = scmp.ge.s32.totalorder %s847_s23, 1 }
   0x4   : > { %p284_p2 = scmp.lt.s32.totalorder %s847_s23, 5 }
   0x5   : > { %s1012_s25 = smov (%p27_p0, %s26_s25), 0 }
   0x6   : > { %p285_p3 = pnand %p708_p1, %p284_p2 }
   0x7   : > { %p350_p4 = scmp.lt.s32.totalorder (!%p285_p3), %s839_s21, 3  ;;  %p717_p5 = scmp.ne.s32.totalorder (!%p285_p3), %s839_s21, 0 }
   0x8   : > { %288 = sbr.rel (%p285_p3) target bundleno = 357 (0x165), region = 44 }
   0xd   : > { %s351_s26 = scalar_select %p350_p4, %s839_s21, 3 }
   0xe   : > { %379 = sbr.rel (%p717_p5) target bundleno = 22 (0x16), region = 48 }
   0xf   : > { %s729_s27 = sshll.u32 %s351_s26, 6  ;;  %s731_s28 = sshll.u32 %s351_s26, 7 }
  0x10   : > { %s915_s7 = scalar_lea.vmem %s1004_s2, %s729_s27  ;;  %s920_s10 = scalar_lea.vmem %s1005_s3, %s729_s27 }
  0x11   : > { %s925_s13 = scalar_lea.vmem %s1006_s4, %s731_s28  ;;  %s732_s14 = sshll.u32 %s351_s26, 4 }
  0x12   : > { %s930_s17 = scalar_lea.vmem %s1007_s5, %s732_s14 }
  0x13   : > { %vm380_vm0 = vcmask 523264   ;;  %v849_v0 = vmov 0.0  }
  0x14   : > { %381 = vst.msk [vmem:[#allocation2] sm:$0xff] %vm380_vm0, %v849_v0 }
  0x15   : > { %382 = vst.msk [vmem:[#allocation2 + $0x8] sm:$0xff] %vm380_vm0, %v849_v0 }
  0x16 PF: > { %v392_v1 = vld [vmem:[%s915_s7 + $0x38] sm:$0xff]  ;;  %v391_v2 = vld [vmem:[%s915_s7 + $0x30] sm:$0xff]  ;;  %v390_v3 = vld [vmem:[%s915_s7 + $0x28] sm:$0xff]  ;;  %vm393_vm1 = vcmask 523264   ;;  %v850_v38 = vmov 0   ;;  %p724_p6 = scmp.ne.s32.totalorder %s839_s21, 3 }
  0x17   : > { %408 = vmatpush.msra.mxu0 %v392_v1  ;;  %v430_v4 = vld [vmem:[%s920_s10 + $0x38] sm:$0xff]  ;;  %v429_v5 = vld [vmem:[%s920_s10 + $0x30] sm:$0xff]  ;;  %v389_v6 = vld [vmem:[%s915_s7 + $0x20] sm:$0xff]  ;;  %784 = vset.pattern.permute.xlu0 %v850_v38 }
  0x18   : > { %439 = vmatpush.msra.mxu1 %v430_v4  ;;  %v428_v7 = vld [vmem:[%s920_s10 + $0x28] sm:$0xff]  ;;  %v388_v8 = vld [vmem:[%s915_s7 + $0x18] sm:$0xff]  ;;  %v427_v9 = vld [vmem:[%s920_s10 + $0x20] sm:$0xff] }
  0x19   : > { %409 = vmatpush.msra.mxu0 %v391_v2  ;;  %v387_v10 = vld [vmem:[%s915_s7 + $0x10] sm:$0xff]  ;;  %v426_v11 = vld [vmem:[%s920_s10 + $0x18] sm:$0xff]  ;;  %v386_v12 = vld [vmem:[%s915_s7 + $0x8] sm:$0xff] }
  0x1a   : > { %440 = vmatpush.msra.mxu1 %v429_v5  ;;  %v425_v13 = vld [vmem:[%s920_s10 + $0x10] sm:$0xff]  ;;  %v385_v14 = vld [vmem:[%s915_s7] sm:$0xff]  ;;  %v424_v16 = vld [vmem:[%s920_s10 + $0x8] sm:$0xff] }
  0x1b   : > { %410 = vmatpush.msra.mxu0 %v390_v3  ;;  %v383_v15 = vld [vmem:[%s1002_s0] sm:$0xff]  ;;  %v384_v18 = vld [vmem:[%s1002_s0 + $0x8] sm:$0xff]  ;;  %v511_v19 = vld [vmem:[%s925_s13 + $0x78] sm:$0xff] }
  0x1c   : > { %441 = vmatpush.msra.mxu1 %v428_v7  ;;  %v423_v17 = vld [vmem:[%s920_s10] sm:$0xff]  ;;  %512 = vmatpush.msra.mxu2 %v511_v19  ;;  %v510_v20 = vld [vmem:[%s925_s13 + $0x70] sm:$0xff]  ;;  %v509_v21 = vld [vmem:[%s925_s13 + $0x68] sm:$0xff] }
  0x1d   : > { %411 = vmatpush.msra.mxu0 %v389_v6  ;;  %733 = vmatpush.msra.mxu3 %v511_v19  ;;  %v508_v22 = vld [vmem:[%s925_s13 + $0x60] sm:$0xff]  ;;  %v507_v23 = vld [vmem:[%s925_s13 + $0x58] sm:$0xff]  ;;  %v506_v24 = vld [vmem:[%s925_s13 + $0x50] sm:$0xff] }
  0x1e   : > { %442 = vmatpush.msra.mxu1 %v427_v9  ;;  %513 = vmatpush.msra.mxu2 %v510_v20  ;;  %v505_v25 = vld [vmem:[%s925_s13 + $0x48] sm:$0xff]  ;;  %v504_v26 = vld [vmem:[%s925_s13 + $0x40] sm:$0xff]  ;;  %v503_v27 = vld [vmem:[%s925_s13 + $0x38] sm:$0xff] }
  0x1f   : > { %412 = vmatpush.msra.mxu0 %v388_v8  ;;  %734 = vmatpush.msra.mxu3 %v510_v20  ;;  %v502_v28 = vld [vmem:[%s925_s13 + $0x30] sm:$0xff]  ;;  %v501_v29 = vld [vmem:[%s925_s13 + $0x28] sm:$0xff]  ;;  %v500_v30 = vld [vmem:[%s925_s13 + $0x20] sm:$0xff] }
  0x20   : > { %443 = vmatpush.msra.mxu1 %v426_v11  ;;  %514 = vmatpush.msra.mxu2 %v509_v21  ;;  %v499_v31 = vld [vmem:[%s925_s13 + $0x18] sm:$0xff]  ;;  %v498_v32 = vld [vmem:[%s925_s13 + $0x10] sm:$0xff]  ;;  %v497_v33 = vld [vmem:[%s925_s13 + $0x8] sm:$0xff] }
  0x21   : > { %413 = vmatpush.msra.mxu0 %v387_v10  ;;  %735 = vmatpush.msra.mxu3 %v509_v21  ;;  %v496_v34 = vld [vmem:[%s925_s13] sm:$0xff]  ;;  %v538_v43 = vld [vmem:[%s930_s17 + $0x8] sm:$0xff] }
  0x22   : > { %444 = vmatpush.msra.mxu1 %v425_v13  ;;  %515 = vmatpush.msra.mxu2 %v508_v22  ;;  %v537_v41 = vld [vmem:[%s930_s17] sm:$0xff] }
  0x23   : > { %414 = vmatpush.msra.mxu0 %v386_v12  ;;  %736 = vmatpush.msra.mxu3 %v508_v22  ;;  %v535_v10 = vld [vmem:[#allocation2] sm:$0xff] }
  0x24   : > { %445 = vmatpush.msra.mxu1 %v424_v16  ;;  %516 = vmatpush.msra.mxu2 %v507_v23 }
  0x25   : > { %415 = vmatpush.msra.mxu0 %v385_v14  ;;  %737 = vmatpush.msra.mxu3 %v507_v23 }
  0x26   : > { %718 = vmatmul.msk.f32.vlgmr.msra.gmra.mxu0 %vm393_vm1, %v383_v15  ;;  %446 = vmatpush.msra.mxu1 %v423_v17 }
  0x27   : > { %720 = vmatmul.msk.f32.vlgmr.msra.gmra.mxu1 %vm393_vm1, %v383_v15  ;;  %517 = vmatpush.msra.mxu2 %v506_v24  ;;  %v536_v15 = vld [vmem:[#allocation2 + $0x8] sm:$0xff] }
  0x28   : > { %738 = vmatpush.msra.mxu3 %v506_v24  ;;  %541 = vperm.xlu0 %784, %v537_v41  }
  0x29   : > { %518 = vmatpush.msra.mxu2 %v505_v25 }
  0x2a   : > { %739 = vmatpush.msra.mxu3 %v505_v25 }
  0x2b   : > { %519 = vmatpush.msra.mxu2 %v504_v26 }
  0x2c   : > { %740 = vmatpush.msra.mxu3 %v504_v26 }
  0x2d   : > { %520 = vmatpush.msra.mxu2 %v503_v27 }
  0x2e   : > { %719 = vmatmul.msk.f32.gmra.mxu0 %vm393_vm1, %v384_v18  ;;  %741 = vmatpush.msra.mxu3 %v503_v27 }
  0x2f   : > { %721 = vmatmul.msk.f32.gmra.mxu1 %vm393_vm1, %v384_v18  ;;  %521 = vmatpush.msra.mxu2 %v502_v28 }
  0x30   : > { %742 = vmatpush.msra.mxu3 %v502_v28  ;;  %546 = vperm.xlu0 %784, %v538_v43  }
  0x31   : > { %522 = vmatpush.msra.mxu2 %v501_v29 }
  0x32   : > { %743 = vmatpush.msra.mxu3 %v501_v29 }
  0x33   : > { %523 = vmatpush.msra.mxu2 %v500_v30 }
  0x34   : > { %744 = vmatpush.msra.mxu3 %v500_v30 }
  0x35   : > { %524 = vmatpush.msra.mxu2 %v499_v31 }
  0x36   : > { %745 = vmatpush.msra.mxu3 %v499_v31 }
  0x37   : > { %525 = vmatpush.msra.mxu2 %v498_v32 }
  0x38   : > { %746 = vmatpush.msra.mxu3 %v498_v32 }
  0x39   : > { %526 = vmatpush.msra.mxu2 %v497_v33 }
  0x3a   : > { %747 = vmatpush.msra.mxu3 %v497_v33 }
  0x3b   : > { %527 = vmatpush.msra.mxu2 %v496_v34 }
  0x3c   : > { %748 = vmatpush.msra.mxu3 %v496_v34 }
  0x9a   : > { %v542_v8 = vpop.permute.xlu0 %541 }
  0xa2   : > { %v547_v13 = vpop.permute.xlu0 %546 }
  0xa3   : > { %v417_v35 = vpop.f32.mrf.mxu0 }
  0xa4   : > { %v722_v36 = vmul.f32 -1.442695, %v417_v35  ;;  %v448_v55 = vpop.f32.mrf.mxu1 }
  0xa6   : > { %785 = vpow2.f32 %v722_v36 }
  0xab   : > { %v420_v37 = vpop.f32.mrf.mxu0 }
  0xac   : > { %v786_v39 = vpop.eup %785  ;;  %v723_v40 = vmul.f32 -1.442695, %v420_v37  ;;  %v451_v5 = vpop.f32.mrf.mxu1 }
  0xad   : > { %v460_v42 = vadd.f32 1.0, %v786_v39 }
  0xae   : > { %787 = vpow2.f32 %v723_v40 }
  0xaf   : > { %789 = vrcp.f32 %v460_v42  ;;  %v473_v49 = vand.u32 2147483648, %v460_v42  ;;  %v471_v51 = vand.u32 2147483647, %v460_v42  ;;  %vm467_vm3 = vweird.f32 %v460_v42 }
  0xb1   : > { %v474_v54 = vor.u32 1.1754944e-38, %v473_v49  ;;  %vm472_vm5 = vcmp.eq.f32.partialorder %v471_v51, 8.507059e+37 }
  0xb4   : > { %v788_v44 = vpop.eup %787 }
  0xb5   : > { %v790_v45 = vpop.eup %789  ;;  %v461_v46 = vadd.f32 1.0, %v788_v44 }
  0xb6   : > { %v463_v47 = vmul.f32 %v790_v45, %v460_v42  ;;  %vm468_vm2 = vweird.f32 %v790_v45 }
  0xb7   : > { %791 = vrcp.f32 %v461_v46  ;;  %vm469_vm4 = vmor %vm467_vm3, %vm468_vm2  ;;  %v488_v61 = vand.u32 2147483648, %v461_v46  ;;  %v486_v63 = vand.u32 2147483647, %v461_v46  ;;  %vm482_vm7 = vweird.f32 %v461_v46 }
  0xb8   : > { %v464_v48 = vsub.f32 1.0, %v463_v47 }
  0xb9   : > { %v489_v2 = vor.u32 1.1754944e-38, %v488_v61  ;;  %vm487_vm9 = vcmp.eq.f32.partialorder %v486_v63, 8.507059e+37 }
  0xba   : > { %v465_v50 = vmul.f32 %v790_v45, %v464_v48 }
  0xbc   : > { %v466_v52 = vadd.f32 %v790_v45, %v465_v50 }
  0xbd   : > { %v792_v53 = vpop.eup %791 }
  0xbe   : > { %v470_v56 = vsel %vm469_vm4, %v790_v45, %v466_v52  ;;  %v478_v57 = vmul.f32 %v792_v53, %v461_v46  ;;  %vm483_vm6 = vweird.f32 %v792_v53 }
  0xbf   : > { %v475_v58 = vsel %vm472_vm5, %v474_v54, %v470_v56  ;;  %vm484_vm8 = vmor %vm482_vm7, %vm483_vm6 }
  0xc0   : > { %v492_v59 = vmul.f32 %v475_v58, %v417_v35  ;;  %v479_v60 = vsub.f32 1.0, %v478_v57 }
  0xc2   : > { %v480_v62 = vmul.f32 %v792_v53, %v479_v60  ;;  %v494_v0 = vmul.f32 %v492_v59, %v448_v55 }
  0xc4   : > { %v481_v1 = vadd.f32 %v792_v53, %v480_v62  ;;  %528 = vmatmul.f32.vlgmr.msra.gmra.mxu2 %v494_v0 }
  0xc6   : > { %v485_v3 = vsel %vm484_vm8, %v792_v53, %v481_v1 }
  0xc7   : > { %v490_v4 = vsel %vm487_vm9, %v489_v2, %v485_v3 }
  0xc8   : > { %v493_v6 = vmul.f32 %v490_v4, %v420_v37 }
  0xca   : > { %v495_v7 = vmul.f32 %v493_v6, %v451_v5 }
  0xcc   : > { %531 = vmatmul.f32.vlgmr.msra.gmra.mxu3 %v495_v7 }
 0x147   : > { %v529_v9 = vpop.f32.mrf.mxu2 }
 0x148   : > { %v549_v11 = vmul.f32 %v542_v8, %v529_v9 }
 0x14a   : > { %v551_v12 = vadd.f32 %v549_v11, %v535_v10 }
 0x14c   : > { %553 = vst.msk [vmem:[#allocation2] sm:$0xff] %vm393_vm1, %v551_v12 }
 0x14f   : > { %v532_v14 = vpop.f32.mrf.mxu3 }
 0x150   : > { %v550_v16 = vmul.f32 %v547_v13, %v532_v14  ;;  %558 = sbr.rel (%p724_p6) target bundleno = 351 (0x15f), region = 52 }
 0x152   : > { %v552_v17 = vadd.f32 %v550_v16, %v536_v15 }
 0x154   : > { %554 = vst.msk [vmem:[#allocation2 + $0x8] sm:$0xff] %vm393_vm1, %v552_v17 }
 0x155   : > { %v559_v18 = vld [vmem:[#allocation2] sm:$0xff]  ;;  %v562_v22 = vld [vmem:[%s1003_s1 + $0x8] sm:$0xff] }
 0x156   : > { %v561_v19 = vld [vmem:[%s1003_s1] sm:$0xff] }
 0x157   : > { %v563_v21 = vadd.f32 %v561_v19, %v559_v18 }
 0x159   : > { %565 = vst.msk [vmem:[#allocation3] sm:$0xff] %vm393_vm1, %v563_v21 }
 0x15b   : > { %v560_v20 = vld [vmem:[#allocation2 + $0x8] sm:$0xff] }
 0x15c   : > { %v564_v23 = vadd.f32 %v562_v22, %v560_v20 }
 0x15e   : > { %566 = vst.msk [vmem:[#allocation3 + $0x8] sm:$0xff] %vm393_vm1, %v564_v23 }
 0x15f PF: > { %p753_p7 = scmp.eq.s32.totalorder %s703_s24, 3  ;;  %s577_s8 = sshll.u32 %s1008_s6, 4  ;;  %s578_s8 = int_to_ptr.hbm [resolvable:$true] %s577_s8 }
 0x160   : > { %s851_s9 = smov [#allocation3]   ;;  %s852_s11 = smov 128  }
 0x161   : > { %s575_s10 = sshll.u32 %s851_s9, 4  ;;  %s853_s12 = smov 8   ;;  %s576_s10 = int_to_ptr.vmem [resolvable:$true] %s575_s10 }
 0x162   : > { %750 = dma.vmem_to_hbm [thread:$0]  (%p753_p7), %s576_s10, 256, %s578_s8, [#allocation4], %s852_s11, %s852_s11, %s853_s12  }
 0x163   : > { %834 = dma.done.wait (%p753_p7), [#allocation4], 256  }
 0x164   : > { %836 = vsyncadd (%p753_p7), [#allocation4], 4294967040 }
 0x165 PF: > { %s17_s23 = sadd.s32 1, %s847_s23   ;;  %s1009_s21 = smov %s843_s22 }
 0x166   : > { %p14_p8 = scmp.ge.s32.totalorder %s17_s23, 6   ;;  %s1010_s22 = smov %s1012_s25 }
 0x168   :  { %16 = sbr.rel (!%p14_p8) target bundleno = 2 (0x2), region = 95 }
 0x16d   :  { %594 = vsyncpa [#allocation4], 1 }
 0x16e   :  { %596 = vsyncpa [#allocation4 + $0x1], 1 }

</bundles_post_ra>
